<compile_context>
chip_gen: v5e
topology: v5e:2x2
jax: 0.10.0
libtpu: 0.0.40
codegen_flags: <defaults>
</compile_context>

<pallas_src>
import jax
import jax.numpy as jnp
from jax.experimental import pallas as pl
from jax.experimental.pallas import tpu as pltpu

# ---- module hyper-parameters (from DecoderNetwork.__init__) ----
K = 5                 # kernel_size
STRIDE = 2
PADDING = 1
LEAKY_SLOPE = 0.2
BN_EPS = 1e-5
# dropout_rate = 0.3 is declared in __init__ but never used in forward()
# TODO(synk): nn.Dropout is unused in forward(); BatchNorm running stats are never updated
#             (forward() output only depends on training-mode batch statistics).

# Sub-pixel decomposition for stride=2, K=5, padding=1: output row 2m+ph reads padded input
# rows m..m+len(taps)-1 (input padded 1 low / 2 high) contracted with these kernel taps.
_PHASE_TAPS = {0: (3, 1), 1: (4, 2, 0)}


# --------------------------- Pallas kernels ---------------------------

def _deconv_pass(xp, w_all, b2, *, OH, OW, fuse_tanh, with_stats):
    """One ConvTranspose2d layer (all 4 sub-pixel phases) as a single pallas_call.

    xp    : [N, H+3, Cin, W+3] bf16  padded (1 low / 2 high per spatial dim) NHCW activation
    w_all : [36, Cout, Cin]    bf16  per-(phase, tap) weight slices (see prepare_params)
    b2    : [Cout, 1]          f32   conv bias
    Returns yt [N, 2*nh, Cout, OW] f32 (tanh'ed if fuse_tanh) and, if with_stats, per-step
    BatchNorm partial sums [N, nh, Cout, 2] (col 0 = sum, col 1 = sum of squares).
    """
    n, hp, cin, wp = xp.shape
    cout = w_all.shape[1]
    nh = (OH + 1) // 2             # output row pairs handled by the grid
    nwm = (OW + 1) // 2            # phase-0 output columns (= max over width phases)
    nw1 = OW // 2                  # phase-1 output columns
    a_taps = {0: range(2), 1: range(3)}   # taps actually used per phase (others are zero)

    def kernel(x_ref, w_ref, b_ref, *out_refs):
        mh = pl.program_id(1)
        # 3 rows of the padded activation slab for this output row pair (in-VMEM patch source)
        xa = [x_ref[0, mh + a] for a in range(3)]          # each (Cin, Wp) bf16

        ys = {}
        for ph in (0, 1):
            for pw in (0, 1):
                acc = None
                for a in a_taps[ph]:
                    for b in a_taps[pw]:
                        xs = xa[a][:, b:b + nwm]            # (Cin, nwm) bf16 patch columns
                        d = jnp.dot(w_ref[((ph * 2 + pw) * 3 + a) * 3 + b], xs,
                                    preferred_element_type=jnp.float32)
                        acc = d if acc is None else acc + d
                ys[(ph, pw)] = acc + b_ref[...]             # (Cout, nwm) f32, bias included

        # interleave the two width phases of each output row with 0/1 spread matmuls
        mw_i = jax.lax.broadcasted_iota(jnp.int32, (nwm, OW), 0)
        ow_i = jax.lax.broadcasted_iota(jnp.int32, (nwm, OW), 1)
        s0 = (ow_i == 2 * mw_i).astype(jnp.float32)
        s1 = (ow_i == 2 * mw_i + 1).astype(jnp.float32)
        row0 = (jnp.dot(ys[(0, 0)], s0, preferred_element_type=jnp.float32)
                + jnp.dot(ys[(0, 1)], s1, preferred_element_type=jnp.float32))
        row1 = (jnp.dot(ys[(1, 0)], s0, preferred_element_type=jnp.float32)
                + jnp.dot(ys[(1, 1)], s1, preferred_element_type=jnp.float32))
        if fuse_tanh:
            row0 = jnp.tanh(row0)
            row1 = jnp.tanh(row1)
        y_ref = out_refs[0]                                 # block (1, 2, Cout, OW)
        y_ref[0, 0] = row0.astype(y_ref.dtype)
        y_ref[0, 1] = row1.astype(y_ref.dtype)

        if with_stats:
            # BatchNorm batch statistics over *valid* output positions only
            lane = jax.lax.broadcasted_iota(jnp.int32, (cout, nwm), 1)
            row1_ok = (2 * mh + 1 < OH).astype(jnp.float32)
            s_tot = jnp.zeros((cout, 1), jnp.float32)
            q_tot = jnp.zeros((cout, 1), jnp.float32)
            for (ph, pw), y in ys.items():
                nw_p = nwm if pw == 0 else nw1
                msk = (lane < nw_p).astype(jnp.float32)
                if ph == 1:
                    msk = msk * row1_ok
                ym = y * msk
                s_tot = s_tot + jnp.sum(ym, axis=1, keepdims=True)
                q_tot = q_tot + jnp.sum(ym * ym, axis=1, keepdims=True)
            st_ref = out_refs[1]                            # block (1, 1, Cout, 2)
            st_ref[0, 0, :, 0:1] = s_tot
            st_ref[0, 0, :, 1:2] = q_tot

    out_shape = [jax.ShapeDtypeStruct((n, 2 * nh, cout, OW), jnp.float32)]
    out_specs = [pl.BlockSpec((1, 2, cout, OW), lambda i, m: (i, m, 0, 0))]
    if with_stats:
        out_shape.append(jax.ShapeDtypeStruct((n, nh, cout, 2), jnp.float32))
        out_specs.append(pl.BlockSpec((1, 1, cout, 2), lambda i, m: (i, m, 0, 0)))

    return pl.pallas_call(
        kernel,
        out_shape=tuple(out_shape),
        grid=(n, nh),
        in_specs=[
            # whole padded image of one batch element stays resident across the mh loop
            pl.BlockSpec((1, hp, cin, wp), lambda i, m: (i, 0, 0, 0)),
            pl.BlockSpec((36, cout, cin), lambda i, m: (0, 0, 0)),
            pl.BlockSpec((cout, 1), lambda i, m: (0, 0)),
        ],
        out_specs=tuple(out_specs),
        compiler_params=pltpu.CompilerParams(dimension_semantics=("parallel", "parallel")),
    )(xp, w_all, b2)


def _bn_pad_pass(yt, scale2, shift2, *, OH, OW):
    """Folded BatchNorm affine + LeakyReLU(0.2), written directly as the next layer's
    zero-padded NHCW bf16 input [N, OH+3, Cout, OW+3] (pad 1 low / 2 high per spatial dim)."""
    n, ohp, cout, _ = yt.shape
    owp = OW + 3

    def kernel(y_ref, sc_ref, sh_ref, o_ref):
        r = pl.program_id(1)
        z = y_ref[0, 0] * sc_ref[...] + sh_ref[...]
        z = jnp.where(z >= 0, z, LEAKY_SLOPE * z)
        interior = jnp.logical_and(r >= 1, r <= OH)
        z = jnp.where(interior, z, 0.0)
        o_ref[...] = jnp.zeros((1, 1, cout, owp), o_ref.dtype)     # zero borders
        o_ref[0, 0, :, 1:1 + OW] = z.astype(o_ref.dtype)

    return pl.pallas_call(
        kernel,
        out_shape=jax.ShapeDtypeStruct((n, OH + 3, cout, owp), jnp.bfloat16),
        grid=(n, OH + 3),
        in_specs=[
            pl.BlockSpec((1, 1, cout, OW),
                         lambda i, r: (i, jnp.minimum(jnp.maximum(r - 1, 0), ohp - 1), 0, 0)),
            pl.BlockSpec((cout, 1), lambda i, r: (0, 0)),
            pl.BlockSpec((cout, 1), lambda i, r: (0, 0)),
        ],
        out_specs=pl.BlockSpec((1, 1, cout, owp), lambda i, r: (i, r, 0, 0)),
        compiler_params=pltpu.CompilerParams(dimension_semantics=("parallel", "parallel")),
    )(yt, scale2, shift2)


# --------------------------- forward ---------------------------

def decoder_forward(prepped, x, output_padding):
    """prepped: list from prepare_params().  x: [N, deconv[0], H, W] NCHW (module boundary)."""
    n, _, h, w = x.shape
    # NCHW -> padded width-on-lane NHCW bf16, once at the boundary
    xp = jnp.pad(jnp.transpose(x, (0, 2, 1, 3)),
                 ((0, 0), (1, 2), (0, 0), (1, 2))).astype(jnp.bfloat16)
    n_layers = len(prepped)
    out = None
    for i, p in enumerate(prepped):
        op = int(output_padding[i])
        oh = (h - 1) * STRIDE - 2 * PADDING + K + op
        ow = (w - 1) * STRIDE - 2 * PADDING + K + op
        cout = p["w_all"].shape[1]
        if i == n_layers - 1:
            (yt,) = _deconv_pass(xp, p["w_all"], p["b"], OH=oh, OW=ow,
                                 fuse_tanh=True, with_stats=False)
            out = jnp.transpose(yt[:, :oh], (0, 2, 1, 3))          # NHCW -> NCHW boundary
            break
        yt, stats = _deconv_pass(xp, p["w_all"], p["b"], OH=oh, OW=ow,
                                 fuse_tanh=False, with_stats=True)
        # BatchNorm2d training-mode batch statistics (biased variance, eps=1e-5) folded into a
        # per-channel scale/shift applied by the fused normalize/pad kernel.
        ssum = jnp.sum(stats, axis=(0, 1))                          # (Cout, 2)
        cnt = float(n * oh * ow)
        mean = ssum[:, 0] / cnt
        var = jnp.maximum(ssum[:, 1] / cnt - mean * mean, 0.0)
        # TODO(synk): E[x^2]-E[x]^2 in f32 can lose precision when |mean| >> std
        scale = p["gamma"] * jax.lax.rsqrt(var + BN_EPS)
        shift = p["beta"] - mean * scale
        xp = _bn_pad_pass(yt,
                          scale.reshape(cout, 1).astype(jnp.float32),
                          shift.reshape(cout, 1).astype(jnp.float32),
                          OH=oh, OW=ow)
        h, w = oh, ow
    return out.astype(jnp.float32)


# --------------------------- parameter init / one-time prep ---------------------------

def init_params(key, deconv):
    """Deterministic ConvTranspose2d / BatchNorm2d parameters in the PyTorch layouts."""
    params = []
    for i in range(len(deconv) - 1):
        key, kw, kb = jax.random.split(key, 3)
        cin, cout = deconv[i], deconv[i + 1]
        w = jax.random.normal(kw, (cin, cout, K, K), jnp.float32) / jnp.sqrt(cin * K * K)
        b = jax.random.normal(kb, (cout,), jnp.float32) * 0.01
        params.append(dict(w=w, b=b,
                           gamma=jnp.ones((cout,), jnp.float32),    # BatchNorm2d defaults
                           beta=jnp.zeros((cout,), jnp.float32)))
    return params, key


def prepare_params(params):
    """One-time weight prep (off the hot path): per-(phase, tap) (Cout, Cin) bf16 slices."""
    prepped = []
    for p in params:
        w = p["w"]                                   # (Cin, Cout, K, K) PyTorch layout
        cin, cout = w.shape[0], w.shape[1]
        w_all = jnp.zeros((36, cout, cin), jnp.float32)
        for ph in (0, 1):
            for pw in (0, 1):
                for a, kh in enumerate(_PHASE_TAPS[ph]):
                    for b, kw_ in enumerate(_PHASE_TAPS[pw]):
                        idx = ((ph * 2 + pw) * 3 + a) * 3 + b
                        w_all = w_all.at[idx].set(w[:, :, kh, kw_].T)
                        # unused (a, b) slots stay zero and are never read by the kernel
        prepped.append(dict(w_all=w_all.astype(jnp.bfloat16),
                            b=p["b"].reshape(cout, 1).astype(jnp.float32),
                            gamma=p["gamma"], beta=p["beta"]))
    return prepped


# --------------------------- pure-JAX reference (f32) ---------------------------

def reference_forward(params, x, output_padding):
    """f32 reference of the PyTorch module (training-mode BatchNorm)."""
    n_layers = len(params)
    for i, p in enumerate(params):
        op = int(output_padding[i])
        wf = p["w"][:, :, ::-1, ::-1]                # flip for the dilated-conv formulation
        y = jax.lax.conv_general_dilated(
            x, wf, window_strides=(1, 1),
            padding=[(K - 1 - PADDING, K - 1 - PADDING + op)] * 2,
            lhs_dilation=(STRIDE, STRIDE), rhs_dilation=(1, 1),
            dimension_numbers=("NCHW", "IOHW", "NCHW"),
            precision=jax.lax.Precision.HIGHEST)
        y = y + p["b"].reshape(1, -1, 1, 1)
        if i == n_layers - 1:
            return jnp.tanh(y)
        mean = jnp.mean(y, axis=(0, 2, 3), keepdims=True)
        var = jnp.mean((y - mean) ** 2, axis=(0, 2, 3), keepdims=True)
        z = (y - mean) * jax.lax.rsqrt(var + BN_EPS)
        z = z * p["gamma"].reshape(1, -1, 1, 1) + p["beta"].reshape(1, -1, 1, 1)
        x = jnp.where(z >= 0, z, LEAKY_SLOPE * z)


if __name__ == "__main__":
    # small config consistent with the module: deconv channel list + per-layer output_padding
    deconv = [8, 4, 3]
    output_padding = (1, 1)
    N, H, W = 2, 4, 4

    key = jax.random.PRNGKey(0)
    params, key = init_params(key, deconv)
    prepped = prepare_params(params)                 # one-time weight prep
    key, kx = jax.random.split(key)
    x = jax.random.normal(kx, (N, deconv[0], H, W), jnp.float32)

    fwd = jax.jit(lambda pp, xx: decoder_forward(pp, xx, output_padding))
    out = jax.block_until_ready(fwd(prepped, x))

    # shape check: H -> (H-1)*2 - 2 + 5 + op   (4 -> 10 -> 22)
    assert out.shape == (N, deconv[-1], 22, 22), out.shape
    assert bool(jnp.all(jnp.isfinite(out)))
    assert bool(jnp.all(jnp.abs(out) <= 1.0 + 1e-6))   # tanh range

    # numerical check vs the f32 reference (tolerance covers the bf16 MXU path)
    ref = reference_forward(params, x, output_padding)
    err = float(jnp.max(jnp.abs(out - ref)))
    assert err < 0.15, f"max |pallas - reference| = {err}"
    print("KERNEL_OK")
</pallas_src>

<mosaic_0001>
module attributes {stable_mosaic.version = 11 : i64} {
  func.func @kernel(%arg0: i32, %arg1: i32, %arg2: memref<1x1x4x10xf32, #tpu.memory_space<vmem>>, %arg3: memref<4x1xf32, #tpu.memory_space<vmem>>, %arg4: memref<4x1xf32, #tpu.memory_space<vmem>>, %arg5: memref<1x1x4x13xbf16, #tpu.memory_space<vmem>>) attributes {dimension_semantics = [#tpu.dimension_semantics<parallel>, #tpu.dimension_semantics<parallel>], iteration_bounds = array<i64: 2, 13>, scalar_prefetch = 0 : i64, scratch_operands = 0 : i64, tpu.core_type = #tpu.core_type<tc>, window_params = [{transform_indices = @transform_0, window_bounds = array<i64: 1, 1, 4, 10>}, {pipeline_mode = #tpu.pipeline_mode<synchronous>, transform_indices = @transform_1, window_bounds = array<i64: 4, 1>}, {pipeline_mode = #tpu.pipeline_mode<synchronous>, transform_indices = @transform_2, window_bounds = array<i64: 4, 1>}, {transform_indices = @transform_3, window_bounds = array<i64: 1, 1, 4, 13>}]} {
    %c0 = arith.constant 0 : index
    %c0_0 = arith.constant 0 : index
    %c0_1 = arith.constant 0 : index
    %c0_2 = arith.constant 0 : index
    %0 = vector.load %arg2[%c0, %c0_0, %c0_1, %c0_2] : memref<1x1x4x10xf32, #tpu.memory_space<vmem>>, vector<1x1x4x10xf32>
    %1 = vector.shape_cast %0 : vector<1x1x4x10xf32> to vector<4x10xf32>
    %c0_3 = arith.constant 0 : index
    %c0_4 = arith.constant 0 : index
    %2 = vector.load %arg3[%c0_3, %c0_4] : memref<4x1xf32, #tpu.memory_space<vmem>>, vector<4x1xf32>
    %3 = vector.broadcast %2 : vector<4x1xf32> to vector<4x10xf32>
    %4 = arith.mulf %1, %3 : vector<4x10xf32>
    %c0_5 = arith.constant 0 : index
    %c0_6 = arith.constant 0 : index
    %5 = vector.load %arg4[%c0_5, %c0_6] : memref<4x1xf32, #tpu.memory_space<vmem>>, vector<4x1xf32>
    %6 = vector.broadcast %5 : vector<4x1xf32> to vector<4x10xf32>
    %7 = arith.addf %4, %6 : vector<4x10xf32>
    %cst = arith.constant 0.000000e+00 : f32
    %8 = vector.broadcast %cst : f32 to vector<4x10xf32>
    %9 = arith.cmpf oge, %7, %8 : vector<4x10xf32>
    %cst_7 = arith.constant 2.000000e-01 : f32
    %10 = vector.broadcast %cst_7 : f32 to vector<4x10xf32>
    %11 = arith.mulf %10, %7 : vector<4x10xf32>
    %12 = arith.select %9, %7, %11 : vector<4x10xi1>, vector<4x10xf32>
    %c1_i32 = arith.constant 1 : i32
    %13 = arith.cmpi sge, %arg1, %c1_i32 : i32
    %c10_i32 = arith.constant 10 : i32
    %14 = arith.cmpi sle, %arg1, %c10_i32 : i32
    %15 = arith.andi %13, %14 : i1
    %cst_8 = arith.constant 0.000000e+00 : f32
    %16 = vector.broadcast %cst_8 : f32 to vector<4x10xf32>
    %17 = arith.select %15, %12, %16 : vector<4x10xf32>
    %cst_9 = arith.constant 0.000000e+00 : bf16
    %18 = vector.broadcast %cst_9 : bf16 to vector<1x1x4x13xbf16>
    %c0_10 = arith.constant 0 : index
    %c0_11 = arith.constant 0 : index
    %c0_12 = arith.constant 0 : index
    %c0_13 = arith.constant 0 : index
    %19 = vector.load %arg5[%c0_10, %c0_11, %c0_12, %c0_13] : memref<1x1x4x13xbf16, #tpu.memory_space<vmem>>, vector<1x1x4x13xbf16>
    tpu.vector_store %arg5[%c0_10, %c0_11, %c0_12, %c0_13], %18 {strides = array<i32>} : memref<1x1x4x13xbf16, #tpu.memory_space<vmem>>, vector<1x1x4x13xbf16>,
    %20 = arith.truncf %17 : vector<4x10xf32> to vector<4x10xbf16>
    %c0_14 = arith.constant 0 : index
    %c0_15 = arith.constant 0 : index
    %c0_16 = arith.constant 0 : index
    %c1 = arith.constant 1 : index
    %21 = vector.load %arg5[%c0_14, %c0_15, %c0_16, %c1] : memref<1x1x4x13xbf16, #tpu.memory_space<vmem>>, vector<1x1x4x10xbf16>
    %22 = vector.shape_cast %21 : vector<1x1x4x10xbf16> to vector<4x10xbf16>
    %23 = vector.shape_cast %20 : vector<4x10xbf16> to vector<1x1x4x10xbf16>
    tpu.vector_store %arg5[%c0_14, %c0_15, %c0_16, %c1], %23 {strides = array<i32>} : memref<1x1x4x13xbf16, #tpu.memory_space<vmem>>, vector<1x1x4x10xbf16>,
    return
  }
  func.func @transform_0(%arg0: i32, %arg1: i32) -> (i32, i32, i32, i32) {
    %c1_i32 = arith.constant 1 : i32
    %0 = arith.subi %arg1, %c1_i32 : i32
    %c0_i32 = arith.constant 0 : i32
    %1 = arith.maxsi %0, %c0_i32 : i32
    %c9_i32 = arith.constant 9 : i32
    %2 = arith.minsi %1, %c9_i32 : i32
    %c0_i32_0 = arith.constant 0 : i32
    %c0_i32_1 = arith.constant 0 : i32
    %c0_i32_2 = arith.constant 0 : i32
    return %arg0, %2, %c0_i32_0, %c0_i32_1 : i32, i32, i32, i32
  }
  func.func @transform_1(%arg0: i32, %arg1: i32) -> (i32, i32) {
    %c0_i32 = arith.constant 0 : i32
    %c0_i32_0 = arith.constant 0 : i32
    %c0_i32_1 = arith.constant 0 : i32
    return %c0_i32, %c0_i32_0 : i32, i32
  }
  func.func @transform_2(%arg0: i32, %arg1: i32) -> (i32, i32) {
    %c0_i32 = arith.constant 0 : i32
    %c0_i32_0 = arith.constant 0 : i32
    %c0_i32_1 = arith.constant 0 : i32
    return %c0_i32, %c0_i32_0 : i32, i32
  }
  func.func @transform_3(%arg0: i32, %arg1: i32) -> (i32, i32, i32, i32) {
    %c0_i32 = arith.constant 0 : i32
    %c0_i32_0 = arith.constant 0 : i32
    %c0_i32_1 = arith.constant 0 : i32
    return %arg0, %arg1, %c0_i32, %c0_i32_0 : i32, i32, i32, i32
  }
}

module attributes {stable_mosaic.version = 11 : i64} {
  func.func @kernel(%arg0: i32, %arg1: i32, %arg2: memref<1x7x8x7xbf16, #tpu.memory_space<vmem>>, %arg3: memref<36x4x8xbf16, #tpu.memory_space<vmem>>, %arg4: memref<4x1xf32, #tpu.memory_space<vmem>>, %arg5: memref<1x2x4x10xf32, #tpu.memory_space<vmem>>, %arg6: memref<1x1x4x2xf32, #tpu.memory_space<vmem>>) attributes {dimension_semantics = [#tpu.dimension_semantics<parallel>, #tpu.dimension_semantics<parallel>], iteration_bounds = array<i64: 2, 5>, scalar_prefetch = 0 : i64, scratch_operands = 0 : i64, tpu.core_type = #tpu.core_type<tc>, window_params = [{transform_indices = @transform_0, window_bounds = array<i64: 1, 7, 8, 7>}, {pipeline_mode = #tpu.pipeline_mode<synchronous>, transform_indices = @transform_1, window_bounds = array<i64: 36, 4, 8>}, {pipeline_mode = #tpu.pipeline_mode<synchronous>, transform_indices = @transform_2, window_bounds = array<i64: 4, 1>}, {transform_indices = @transform_3, window_bounds = array<i64: 1, 2, 4, 10>}, {transform_indices = @transform_4, window_bounds = array<i64: 1, 1, 4, 2>}]} {
    %c0_i32 = arith.constant 0 : i32
    %0 = arith.addi %arg1, %c0_i32 : i32
    %c0 = arith.constant 0 : index
    %1 = arith.index_cast %0 : i32 to index
    %c0_0 = arith.constant 0 : index
    %c0_1 = arith.constant 0 : index
    %2 = vector.load %arg2[%c0, %1, %c0_0, %c0_1] : memref<1x7x8x7xbf16, #tpu.memory_space<vmem>>, vector<1x1x8x7xbf16>
    %3 = vector.shape_cast %2 : vector<1x1x8x7xbf16> to vector<8x7xbf16>
    %c1_i32 = arith.constant 1 : i32
    %4 = arith.addi %arg1, %c1_i32 : i32
    %c0_2 = arith.constant 0 : index
    %5 = arith.index_cast %4 : i32 to index
    %c0_3 = arith.constant 0 : index
    %c0_4 = arith.constant 0 : index
    %6 = vector.load %arg2[%c0_2, %5, %c0_3, %c0_4] : memref<1x7x8x7xbf16, #tpu.memory_space<vmem>>, vector<1x1x8x7xbf16>
    %7 = vector.shape_cast %6 : vector<1x1x8x7xbf16> to vector<8x7xbf16>
    %c2_i32 = arith.constant 2 : i32
    %8 = arith.addi %arg1, %c2_i32 : i32
    %c0_5 = arith.constant 0 : index
    %9 = arith.index_cast %8 : i32 to index
    %c0_6 = arith.constant 0 : index
    %c0_7 = arith.constant 0 : index
    %10 = vector.load %arg2[%c0_5, %9, %c0_6, %c0_7] : memref<1x7x8x7xbf16, #tpu.memory_space<vmem>>, vector<1x1x8x7xbf16>
    %11 = vector.shape_cast %10 : vector<1x1x8x7xbf16> to vector<8x7xbf16>
    %12 = vector.extract_strided_slice %3 {offsets = [0, 0], sizes = [8, 5], strides = [1, 1]} : vector<8x7xbf16> to vector<8x5xbf16>
    %c0_8 = arith.constant 0 : index
    %c0_9 = arith.constant 0 : index
    %c0_10 = arith.constant 0 : index
    %13 = vector.load %arg3[%c0_8, %c0_9, %c0_10] : memref<36x4x8xbf16, #tpu.memory_space<vmem>>, vector<1x4x8xbf16>
    %14 = vector.shape_cast %13 : vector<1x4x8xbf16> to vector<4x8xbf16>
    %cst = arith.constant dense<0.000000e+00> : vector<4x5xf32>
    %15 = tpu.matmul %14, %12, %cst {dimension_numbers = #tpu.dot_dimension_numbers<[1], [0], [0], [1], [0, 0, 1, 1], [], []>} : vector<4x8xbf16>, vector<8x5xbf16>, vector<4x5xf32> -> vector<4x5xf32>
    %16 = vector.extract_strided_slice %3 {offsets = [0, 1], sizes = [8, 5], strides = [1, 1]} : vector<8x7xbf16> to vector<8x5xbf16>
    %c1 = arith.constant 1 : index
    %c0_11 = arith.constant 0 : index
    %c0_12 = arith.constant 0 : index
    %17 = vector.load %arg3[%c1, %c0_11, %c0_12] : memref<36x4x8xbf16, #tpu.memory_space<vmem>>, vector<1x4x8xbf16>
    %18 = vector.shape_cast %17 : vector<1x4x8xbf16> to vector<4x8xbf16>
    %cst_13 = arith.constant dense<0.000000e+00> : vector<4x5xf32>
    %19 = tpu.matmul %18, %16, %cst_13 {dimension_numbers = #tpu.dot_dimension_numbers<[1], [0], [0], [1], [0, 0, 1, 1], [], []>} : vector<4x8xbf16>, vector<8x5xbf16>, vector<4x5xf32> -> vector<4x5xf32>
    %20 = arith.addf %15, %19 : vector<4x5xf32>
    %21 = vector.extract_strided_slice %7 {offsets = [0, 0], sizes = [8, 5], strides = [1, 1]} : vector<8x7xbf16> to vector<8x5xbf16>
    %c3 = arith.constant 3 : index
    %c0_14 = arith.constant 0 : index
    %c0_15 = arith.constant 0 : index
    %22 = vector.load %arg3[%c3, %c0_14, %c0_15] : memref<36x4x8xbf16, #tpu.memory_space<vmem>>, vector<1x4x8xbf16>
    %23 = vector.shape_cast %22 : vector<1x4x8xbf16> to vector<4x8xbf16>
    %cst_16 = arith.constant dense<0.000000e+00> : vector<4x5xf32>
    %24 = tpu.matmul %23, %21, %cst_16 {dimension_numbers = #tpu.dot_dimension_numbers<[1], [0], [0], [1], [0, 0, 1, 1], [], []>} : vector<4x8xbf16>, vector<8x5xbf16>, vector<4x5xf32> -> vector<4x5xf32>
    %25 = arith.addf %20, %24 : vector<4x5xf32>
    %26 = vector.extract_strided_slice %7 {offsets = [0, 1], sizes = [8, 5], strides = [1, 1]} : vector<8x7xbf16> to vector<8x5xbf16>
    %c4 = arith.constant 4 : index
    %c0_17 = arith.constant 0 : index
    %c0_18 = arith.constant 0 : index
    %27 = vector.load %arg3[%c4, %c0_17, %c0_18] : memref<36x4x8xbf16, #tpu.memory_space<vmem>>, vector<1x4x8xbf16>
    %28 = vector.shape_cast %27 : vector<1x4x8xbf16> to vector<4x8xbf16>
    %cst_19 = arith.constant dense<0.000000e+00> : vector<4x5xf32>
    %29 = tpu.matmul %28, %26, %cst_19 {dimension_numbers = #tpu.dot_dimension_numbers<[1], [0], [0], [1], [0, 0, 1, 1], [], []>} : vector<4x8xbf16>, vector<8x5xbf16>, vector<4x5xf32> -> vector<4x5xf32>
    %30 = arith.addf %25, %29 : vector<4x5xf32>
    %c0_20 = arith.constant 0 : index
    %c0_21 = arith.constant 0 : index
    %31 = vector.load %arg4[%c0_20, %c0_21] : memref<4x1xf32, #tpu.memory_space<vmem>>, vector<4x1xf32>
    %32 = vector.broadcast %31 : vector<4x1xf32> to vector<4x5xf32>
    %33 = arith.addf %30, %32 : vector<4x5xf32>
    %34 = vector.extract_strided_slice %3 {offsets = [0, 0], sizes = [8, 5], strides = [1, 1]} : vector<8x7xbf16> to vector<8x5xbf16>
    %c9 = arith.constant 9 : index
    %c0_22 = arith.constant 0 : index
    %c0_23 = arith.constant 0 : index
    %35 = vector.load %arg3[%c9, %c0_22, %c0_23] : memref<36x4x8xbf16, #tpu.memory_space<vmem>>, vector<1x4x8xbf16>
    %36 = vector.shape_cast %35 : vector<1x4x8xbf16> to vector<4x8xbf16>
    %cst_24 = arith.constant dense<0.000000e+00> : vector<4x5xf32>
    %37 = tpu.matmul %36, %34, %cst_24 {dimension_numbers = #tpu.dot_dimension_numbers<[1], [0], [0], [1], [0, 0, 1, 1], [], []>} : vector<4x8xbf16>, vector<8x5xbf16>, vector<4x5xf32> -> vector<4x5xf32>
    %38 = vector.extract_strided_slice %3 {offsets = [0, 1], sizes = [8, 5], strides = [1, 1]} : vector<8x7xbf16> to vector<8x5xbf16>
    %c10 = arith.constant 10 : index
    %c0_25 = arith.constant 0 : index
    %c0_26 = arith.constant 0 : index
    %39 = vector.load %arg3[%c10, %c0_25, %c0_26] : memref<36x4x8xbf16, #tpu.memory_space<vmem>>, vector<1x4x8xbf16>
    %40 = vector.shape_cast %39 : vector<1x4x8xbf16> to vector<4x8xbf16>
    %cst_27 = arith.constant dense<0.000000e+00> : vector<4x5xf32>
    %41 = tpu.matmul %40, %38, %cst_27 {dimension_numbers = #tpu.dot_dimension_numbers<[1], [0], [0], [1], [0, 0, 1, 1], [], []>} : vector<4x8xbf16>, vector<8x5xbf16>, vector<4x5xf32> -> vector<4x5xf32>
    %42 = arith.addf %37, %41 : vector<4x5xf32>
    %43 = vector.extract_strided_slice %3 {offsets = [0, 2], sizes = [8, 5], strides = [1, 1]} : vector<8x7xbf16> to vector<8x5xbf16>
    %c11 = arith.constant 11 : index
    %c0_28 = arith.constant 0 : index
    %c0_29 = arith.constant 0 : index
    %44 = vector.load %arg3[%c11, %c0_28, %c0_29] : memref<36x4x8xbf16, #tpu.memory_space<vmem>>, vector<1x4x8xbf16>
    %45 = vector.shape_cast %44 : vector<1x4x8xbf16> to vector<4x8xbf16>
    %cst_30 = arith.constant dense<0.000000e+00> : vector<4x5xf32>
    %46 = tpu.matmul %45, %43, %cst_30 {dimension_numbers = #tpu.dot_dimension_numbers<[1], [0], [0], [1], [0, 0, 1, 1], [], []>} : vector<4x8xbf16>, vector<8x5xbf16>, vector<4x5xf32> -> vector<4x5xf32>
    %47 = arith.addf %42, %46 : vector<4x5xf32>
    %48 = vector.extract_strided_slice %7 {offsets = [0, 0], sizes = [8, 5], strides = [1, 1]} : vector<8x7xbf16> to vector<8x5xbf16>
    %c12 = arith.constant 12 : index
    %c0_31 = arith.constant 0 : index
    %c0_32 = arith.constant 0 : index
    %49 = vector.load %arg3[%c12, %c0_31, %c0_32] : memref<36x4x8xbf16, #tpu.memory_space<vmem>>, vector<1x4x8xbf16>
    %50 = vector.shape_cast %49 : vector<1x4x8xbf16> to vector<4x8xbf16>
    %cst_33 = arith.constant dense<0.000000e+00> : vector<4x5xf32>
    %51 = tpu.matmul %50, %48, %cst_33 {dimension_numbers = #tpu.dot_dimension_numbers<[1], [0], [0], [1], [0, 0, 1, 1], [], []>} : vector<4x8xbf16>, vector<8x5xbf16>, vector<4x5xf32> -> vector<4x5xf32>
    %52 = arith.addf %47, %51 : vector<4x5xf32>
    %53 = vector.extract_strided_slice %7 {offsets = [0, 1], sizes = [8, 5], strides = [1, 1]} : vector<8x7xbf16> to vector<8x5xbf16>
    %c13 = arith.constant 13 : index
    %c0_34 = arith.constant 0 : index
    %c0_35 = arith.constant 0 : index
    %54 = vector.load %arg3[%c13, %c0_34, %c0_35] : memref<36x4x8xbf16, #tpu.memory_space<vmem>>, vector<1x4x8xbf16>
    %55 = vector.shape_cast %54 : vector<1x4x8xbf16> to vector<4x8xbf16>
    %cst_36 = arith.constant dense<0.000000e+00> : vector<4x5xf32>
    %56 = tpu.matmul %55, %53, %cst_36 {dimension_numbers = #tpu.dot_dimension_numbers<[1], [0], [0], [1], [0, 0, 1, 1], [], []>} : vector<4x8xbf16>, vector<8x5xbf16>, vector<4x5xf32> -> vector<4x5xf32>
    %57 = arith.addf %52, %56 : vector<4x5xf32>
    %58 = vector.extract_strided_slice %7 {offsets = [0, 2], sizes = [8, 5], strides = [1, 1]} : vector<8x7xbf16> to vector<8x5xbf16>
    %c14 = arith.constant 14 : index
    %c0_37 = arith.constant 0 : index
    %c0_38 = arith.constant 0 : index
    %59 = vector.load %arg3[%c14, %c0_37, %c0_38] : memref<36x4x8xbf16, #tpu.memory_space<vmem>>, vector<1x4x8xbf16>
    %60 = vector.shape_cast %59 : vector<1x4x8xbf16> to vector<4x8xbf16>
    %cst_39 = arith.constant dense<0.000000e+00> : vector<4x5xf32>
    %61 = tpu.matmul %60, %58, %cst_39 {dimension_numbers = #tpu.dot_dimension_numbers<[1], [0], [0], [1], [0, 0, 1, 1], [], []>} : vector<4x8xbf16>, vector<8x5xbf16>, vector<4x5xf32> -> vector<4x5xf32>
    %62 = arith.addf %57, %61 : vector<4x5xf32>
    %c0_40 = arith.constant 0 : index
    %c0_41 = arith.constant 0 : index
    %63 = vector.load %arg4[%c0_40, %c0_41] : memref<4x1xf32, #tpu.memory_space<vmem>>, vector<4x1xf32>
    %64 = vector.broadcast %63 : vector<4x1xf32> to vector<4x5xf32>
    %65 = arith.addf %62, %64 : vector<4x5xf32>
    %66 = vector.extract_strided_slice %3 {offsets = [0, 0], sizes = [8, 5], strides = [1, 1]} : vector<8x7xbf16> to vector<8x5xbf16>
    %c18 = arith.constant 18 : index
    %c0_42 = arith.constant 0 : index
    %c0_43 = arith.constant 0 : index
    %67 = vector.load %arg3[%c18, %c0_42, %c0_43] : memref<36x4x8xbf16, #tpu.memory_space<vmem>>, vector<1x4x8xbf16>
    %68 = vector.shape_cast %67 : vector<1x4x8xbf16> to vector<4x8xbf16>
    %cst_44 = arith.constant dense<0.000000e+00> : vector<4x5xf32>
    %69 = tpu.matmul %68, %66, %cst_44 {dimension_numbers = #tpu.dot_dimension_numbers<[1], [0], [0], [1], [0, 0, 1, 1], [], []>} : vector<4x8xbf16>, vector<8x5xbf16>, vector<4x5xf32> -> vector<4x5xf32>
    %70 = vector.extract_strided_slice %3 {offsets = [0, 1], sizes = [8, 5], strides = [1, 1]} : vector<8x7xbf16> to vector<8x5xbf16>
    %c19 = arith.constant 19 : index
    %c0_45 = arith.constant 0 : index
    %c0_46 = arith.constant 0 : index
    %71 = vector.load %arg3[%c19, %c0_45, %c0_46] : memref<36x4x8xbf16, #tpu.memory_space<vmem>>, vector<1x4x8xbf16>
    %72 = vector.shape_cast %71 : vector<1x4x8xbf16> to vector<4x8xbf16>
    %cst_47 = arith.constant dense<0.000000e+00> : vector<4x5xf32>
    %73 = tpu.matmul %72, %70, %cst_47 {dimension_numbers = #tpu.dot_dimension_numbers<[1], [0], [0], [1], [0, 0, 1, 1], [], []>} : vector<4x8xbf16>, vector<8x5xbf16>, vector<4x5xf32> -> vector<4x5xf32>
    %74 = arith.addf %69, %73 : vector<4x5xf32>
    %75 = vector.extract_strided_slice %7 {offsets = [0, 0], sizes = [8, 5], strides = [1, 1]} : vector<8x7xbf16> to vector<8x5xbf16>
    %c21 = arith.constant 21 : index
    %c0_48 = arith.constant 0 : index
    %c0_49 = arith.constant 0 : index
    %76 = vector.load %arg3[%c21, %c0_48, %c0_49] : memref<36x4x8xbf16, #tpu.memory_space<vmem>>, vector<1x4x8xbf16>
    %77 = vector.shape_cast %76 : vector<1x4x8xbf16> to vector<4x8xbf16>
    %cst_50 = arith.constant dense<0.000000e+00> : vector<4x5xf32>
    %78 = tpu.matmul %77, %75, %cst_50 {dimension_numbers = #tpu.dot_dimension_numbers<[1], [0], [0], [1], [0, 0, 1, 1], [], []>} : vector<4x8xbf16>, vector<8x5xbf16>, vector<4x5xf32> -> vector<4x5xf32>
    %79 = arith.addf %74, %78 : vector<4x5xf32>
    %80 = vector.extract_strided_slice %7 {offsets = [0, 1], sizes = [8, 5], strides = [1, 1]} : vector<8x7xbf16> to vector<8x5xbf16>
    %c22 = arith.constant 22 : index
    %c0_51 = arith.constant 0 : index
    %c0_52 = arith.constant 0 : index
    %81 = vector.load %arg3[%c22, %c0_51, %c0_52] : memref<36x4x8xbf16, #tpu.memory_space<vmem>>, vector<1x4x8xbf16>
    %82 = vector.shape_cast %81 : vector<1x4x8xbf16> to vector<4x8xbf16>
    %cst_53 = arith.constant dense<0.000000e+00> : vector<4x5xf32>
    %83 = tpu.matmul %82, %80, %cst_53 {dimension_numbers = #tpu.dot_dimension_numbers<[1], [0], [0], [1], [0, 0, 1, 1], [], []>} : vector<4x8xbf16>, vector<8x5xbf16>, vector<4x5xf32> -> vector<4x5xf32>
    %84 = arith.addf %79, %83 : vector<4x5xf32>
    %85 = vector.extract_strided_slice %11 {offsets = [0, 0], sizes = [8, 5], strides = [1, 1]} : vector<8x7xbf16> to vector<8x5xbf16>
    %c24 = arith.constant 24 : index
    %c0_54 = arith.constant 0 : index
    %c0_55 = arith.constant 0 : index
    %86 = vector.load %arg3[%c24, %c0_54, %c0_55] : memref<36x4x8xbf16, #tpu.memory_space<vmem>>, vector<1x4x8xbf16>
    %87 = vector.shape_cast %86 : vector<1x4x8xbf16> to vector<4x8xbf16>
    %cst_56 = arith.constant dense<0.000000e+00> : vector<4x5xf32>
    %88 = tpu.matmul %87, %85, %cst_56 {dimension_numbers = #tpu.dot_dimension_numbers<[1], [0], [0], [1], [0, 0, 1, 1], [], []>} : vector<4x8xbf16>, vector<8x5xbf16>, vector<4x5xf32> -> vector<4x5xf32>
    %89 = arith.addf %84, %88 : vector<4x5xf32>
    %90 = vector.extract_strided_slice %11 {offsets = [0, 1], sizes = [8, 5], strides = [1, 1]} : vector<8x7xbf16> to vector<8x5xbf16>
    %c25 = arith.constant 25 : index
    %c0_57 = arith.constant 0 : index
    %c0_58 = arith.constant 0 : index
    %91 = vector.load %arg3[%c25, %c0_57, %c0_58] : memref<36x4x8xbf16, #tpu.memory_space<vmem>>, vector<1x4x8xbf16>
    %92 = vector.shape_cast %91 : vector<1x4x8xbf16> to vector<4x8xbf16>
    %cst_59 = arith.constant dense<0.000000e+00> : vector<4x5xf32>
    %93 = tpu.matmul %92, %90, %cst_59 {dimension_numbers = #tpu.dot_dimension_numbers<[1], [0], [0], [1], [0, 0, 1, 1], [], []>} : vector<4x8xbf16>, vector<8x5xbf16>, vector<4x5xf32> -> vector<4x5xf32>
    %94 = arith.addf %89, %93 : vector<4x5xf32>
    %c0_60 = arith.constant 0 : index
    %c0_61 = arith.constant 0 : index
    %95 = vector.load %arg4[%c0_60, %c0_61] : memref<4x1xf32, #tpu.memory_space<vmem>>, vector<4x1xf32>
    %96 = vector.broadcast %95 : vector<4x1xf32> to vector<4x5xf32>
    %97 = arith.addf %94, %96 : vector<4x5xf32>
    %98 = vector.extract_strided_slice %3 {offsets = [0, 0], sizes = [8, 5], strides = [1, 1]} : vector<8x7xbf16> to vector<8x5xbf16>
    %c27 = arith.constant 27 : index
    %c0_62 = arith.constant 0 : index
    %c0_63 = arith.constant 0 : index
    %99 = vector.load %arg3[%c27, %c0_62, %c0_63] : memref<36x4x8xbf16, #tpu.memory_space<vmem>>, vector<1x4x8xbf16>
    %100 = vector.shape_cast %99 : vector<1x4x8xbf16> to vector<4x8xbf16>
    %cst_64 = arith.constant dense<0.000000e+00> : vector<4x5xf32>
    %101 = tpu.matmul %100, %98, %cst_64 {dimension_numbers = #tpu.dot_dimension_numbers<[1], [0], [0], [1], [0, 0, 1, 1], [], []>} : vector<4x8xbf16>, vector<8x5xbf16>, vector<4x5xf32> -> vector<4x5xf32>
    %102 = vector.extract_strided_slice %3 {offsets = [0, 1], sizes = [8, 5], strides = [1, 1]} : vector<8x7xbf16> to vector<8x5xbf16>
    %c28 = arith.constant 28 : index
    %c0_65 = arith.constant 0 : index
    %c0_66 = arith.constant 0 : index
    %103 = vector.load %arg3[%c28, %c0_65, %c0_66] : memref<36x4x8xbf16, #tpu.memory_space<vmem>>, vector<1x4x8xbf16>
    %104 = vector.shape_cast %103 : vector<1x4x8xbf16> to vector<4x8xbf16>
    %cst_67 = arith.constant dense<0.000000e+00> : vector<4x5xf32>
    %105 = tpu.matmul %104, %102, %cst_67 {dimension_numbers = #tpu.dot_dimension_numbers<[1], [0], [0], [1], [0, 0, 1, 1], [], []>} : vector<4x8xbf16>, vector<8x5xbf16>, vector<4x5xf32> -> vector<4x5xf32>
    %106 = arith.addf %101, %105 : vector<4x5xf32>
    %107 = vector.extract_strided_slice %3 {offsets = [0, 2], sizes = [8, 5], strides = [1, 1]} : vector<8x7xbf16> to vector<8x5xbf16>
    %c29 = arith.constant 29 : index
    %c0_68 = arith.constant 0 : index
    %c0_69 = arith.constant 0 : index
    %108 = vector.load %arg3[%c29, %c0_68, %c0_69] : memref<36x4x8xbf16, #tpu.memory_space<vmem>>, vector<1x4x8xbf16>
    %109 = vector.shape_cast %108 : vector<1x4x8xbf16> to vector<4x8xbf16>
    %cst_70 = arith.constant dense<0.000000e+00> : vector<4x5xf32>
    %110 = tpu.matmul %109, %107, %cst_70 {dimension_numbers = #tpu.dot_dimension_numbers<[1], [0], [0], [1], [0, 0, 1, 1], [], []>} : vector<4x8xbf16>, vector<8x5xbf16>, vector<4x5xf32> -> vector<4x5xf32>
    %111 = arith.addf %106, %110 : vector<4x5xf32>
    %112 = vector.extract_strided_slice %7 {offsets = [0, 0], sizes = [8, 5], strides = [1, 1]} : vector<8x7xbf16> to vector<8x5xbf16>
    %c30 = arith.constant 30 : index
    %c0_71 = arith.constant 0 : index
    %c0_72 = arith.constant 0 : index
    %113 = vector.load %arg3[%c30, %c0_71, %c0_72] : memref<36x4x8xbf16, #tpu.memory_space<vmem>>, vector<1x4x8xbf16>
    %114 = vector.shape_cast %113 : vector<1x4x8xbf16> to vector<4x8xbf16>
    %cst_73 = arith.constant dense<0.000000e+00> : vector<4x5xf32>
    %115 = tpu.matmul %114, %112, %cst_73 {dimension_numbers = #tpu.dot_dimension_numbers<[1], [0], [0], [1], [0, 0, 1, 1], [], []>} : vector<4x8xbf16>, vector<8x5xbf16>, vector<4x5xf32> -> vector<4x5xf32>
    %116 = arith.addf %111, %115 : vector<4x5xf32>
    %117 = vector.extract_strided_slice %7 {offsets = [0, 1], sizes = [8, 5], strides = [1, 1]} : vector<8x7xbf16> to vector<8x5xbf16>
    %c31 = arith.constant 31 : index
    %c0_74 = arith.constant 0 : index
    %c0_75 = arith.constant 0 : index
    %118 = vector.load %arg3[%c31, %c0_74, %c0_75] : memref<36x4x8xbf16, #tpu.memory_space<vmem>>, vector<1x4x8xbf16>
    %119 = vector.shape_cast %118 : vector<1x4x8xbf16> to vector<4x8xbf16>
    %cst_76 = arith.constant dense<0.000000e+00> : vector<4x5xf32>
    %120 = tpu.matmul %119, %117, %cst_76 {dimension_numbers = #tpu.dot_dimension_numbers<[1], [0], [0], [1], [0, 0, 1, 1], [], []>} : vector<4x8xbf16>, vector<8x5xbf16>, vector<4x5xf32> -> vector<4x5xf32>
    %121 = arith.addf %116, %120 : vector<4x5xf32>
    %122 = vector.extract_strided_slice %7 {offsets = [0, 2], sizes = [8, 5], strides = [1, 1]} : vector<8x7xbf16> to vector<8x5xbf16>
    %c32 = arith.constant 32 : index
    %c0_77 = arith.constant 0 : index
    %c0_78 = arith.constant 0 : index
    %123 = vector.load %arg3[%c32, %c0_77, %c0_78] : memref<36x4x8xbf16, #tpu.memory_space<vmem>>, vector<1x4x8xbf16>
    %124 = vector.shape_cast %123 : vector<1x4x8xbf16> to vector<4x8xbf16>
    %cst_79 = arith.constant dense<0.000000e+00> : vector<4x5xf32>
    %125 = tpu.matmul %124, %122, %cst_79 {dimension_numbers = #tpu.dot_dimension_numbers<[1], [0], [0], [1], [0, 0, 1, 1], [], []>} : vector<4x8xbf16>, vector<8x5xbf16>, vector<4x5xf32> -> vector<4x5xf32>
    %126 = arith.addf %121, %125 : vector<4x5xf32>
    %127 = vector.extract_strided_slice %11 {offsets = [0, 0], sizes = [8, 5], strides = [1, 1]} : vector<8x7xbf16> to vector<8x5xbf16>
    %c33 = arith.constant 33 : index
    %c0_80 = arith.constant 0 : index
    %c0_81 = arith.constant 0 : index
    %128 = vector.load %arg3[%c33, %c0_80, %c0_81] : memref<36x4x8xbf16, #tpu.memory_space<vmem>>, vector<1x4x8xbf16>
    %129 = vector.shape_cast %128 : vector<1x4x8xbf16> to vector<4x8xbf16>
    %cst_82 = arith.constant dense<0.000000e+00> : vector<4x5xf32>
    %130 = tpu.matmul %129, %127, %cst_82 {dimension_numbers = #tpu.dot_dimension_numbers<[1], [0], [0], [1], [0, 0, 1, 1], [], []>} : vector<4x8xbf16>, vector<8x5xbf16>, vector<4x5xf32> -> vector<4x5xf32>
    %131 = arith.addf %126, %130 : vector<4x5xf32>
    %132 = vector.extract_strided_slice %11 {offsets = [0, 1], sizes = [8, 5], strides = [1, 1]} : vector<8x7xbf16> to vector<8x5xbf16>
    %c34 = arith.constant 34 : index
    %c0_83 = arith.constant 0 : index
    %c0_84 = arith.constant 0 : index
    %133 = vector.load %arg3[%c34, %c0_83, %c0_84] : memref<36x4x8xbf16, #tpu.memory_space<vmem>>, vector<1x4x8xbf16>
    %134 = vector.shape_cast %133 : vector<1x4x8xbf16> to vector<4x8xbf16>
    %cst_85 = arith.constant dense<0.000000e+00> : vector<4x5xf32>
    %135 = tpu.matmul %134, %132, %cst_85 {dimension_numbers = #tpu.dot_dimension_numbers<[1], [0], [0], [1], [0, 0, 1, 1], [], []>} : vector<4x8xbf16>, vector<8x5xbf16>, vector<4x5xf32> -> vector<4x5xf32>
    %136 = arith.addf %131, %135 : vector<4x5xf32>
    %137 = vector.extract_strided_slice %11 {offsets = [0, 2], sizes = [8, 5], strides = [1, 1]} : vector<8x7xbf16> to vector<8x5xbf16>
    %c35 = arith.constant 35 : index
    %c0_86 = arith.constant 0 : index
    %c0_87 = arith.constant 0 : index
    %138 = vector.load %arg3[%c35, %c0_86, %c0_87] : memref<36x4x8xbf16, #tpu.memory_space<vmem>>, vector<1x4x8xbf16>
    %139 = vector.shape_cast %138 : vector<1x4x8xbf16> to vector<4x8xbf16>
    %cst_88 = arith.constant dense<0.000000e+00> : vector<4x5xf32>
    %140 = tpu.matmul %139, %137, %cst_88 {dimension_numbers = #tpu.dot_dimension_numbers<[1], [0], [0], [1], [0, 0, 1, 1], [], []>} : vector<4x8xbf16>, vector<8x5xbf16>, vector<4x5xf32> -> vector<4x5xf32>
    %141 = arith.addf %136, %140 : vector<4x5xf32>
    %c0_89 = arith.constant 0 : index
    %c0_90 = arith.constant 0 : index
    %142 = vector.load %arg4[%c0_89, %c0_90] : memref<4x1xf32, #tpu.memory_space<vmem>>, vector<4x1xf32>
    %143 = vector.broadcast %142 : vector<4x1xf32> to vector<4x5xf32>
    %144 = arith.addf %141, %143 : vector<4x5xf32>
    %145 = tpu.iota {dimensions = array<i32: 0>} : vector<5x10xi32>
    %146 = tpu.iota {dimensions = array<i32: 1>} : vector<5x10xi32>
    %c2_i32_91 = arith.constant 2 : i32
    %147 = vector.broadcast %c2_i32_91 : i32 to vector<5x10xi32>
    %148 = arith.muli %147, %145 : vector<5x10xi32>
    %149 = arith.cmpi eq, %146, %148 : vector<5x10xi32>
    %150 = arith.extui %149 : vector<5x10xi1> to vector<5x10xi32>
    %151 = arith.sitofp %150 : vector<5x10xi32> to vector<5x10xf32>
    %c2_i32_92 = arith.constant 2 : i32
    %152 = vector.broadcast %c2_i32_92 : i32 to vector<5x10xi32>
    %153 = arith.muli %152, %145 : vector<5x10xi32>
    %c1_i32_93 = arith.constant 1 : i32
    %154 = vector.broadcast %c1_i32_93 : i32 to vector<5x10xi32>
    %155 = arith.addi %153, %154 : vector<5x10xi32>
    %156 = arith.cmpi eq, %146, %155 : vector<5x10xi32>
    %157 = arith.extui %156 : vector<5x10xi1> to vector<5x10xi32>
    %158 = arith.sitofp %157 : vector<5x10xi32> to vector<5x10xf32>
    %cst_94 = arith.constant dense<0.000000e+00> : vector<4x10xf32>
    %159 = tpu.matmul %33, %151, %cst_94 {dimension_numbers = #tpu.dot_dimension_numbers<[1], [0], [0], [1], [0, 0, 1, 1], [], []>} : vector<4x5xf32>, vector<5x10xf32>, vector<4x10xf32> -> vector<4x10xf32>
    %cst_95 = arith.constant dense<0.000000e+00> : vector<4x10xf32>
    %160 = tpu.matmul %65, %158, %cst_95 {dimension_numbers = #tpu.dot_dimension_numbers<[1], [0], [0], [1], [0, 0, 1, 1], [], []>} : vector<4x5xf32>, vector<5x10xf32>, vector<4x10xf32> -> vector<4x10xf32>
    %161 = arith.addf %159, %160 : vector<4x10xf32>
    %cst_96 = arith.constant dense<0.000000e+00> : vector<4x10xf32>
    %162 = tpu.matmul %97, %151, %cst_96 {dimension_numbers = #tpu.dot_dimension_numbers<[1], [0], [0], [1], [0, 0, 1, 1], [], []>} : vector<4x5xf32>, vector<5x10xf32>, vector<4x10xf32> -> vector<4x10xf32>
    %cst_97 = arith.constant dense<0.000000e+00> : vector<4x10xf32>
    %163 = tpu.matmul %144, %158, %cst_97 {dimension_numbers = #tpu.dot_dimension_numbers<[1], [0], [0], [1], [0, 0, 1, 1], [], []>} : vector<4x5xf32>, vector<5x10xf32>, vector<4x10xf32> -> vector<4x10xf32>
    %164 = arith.addf %162, %163 : vector<4x10xf32>
    %c0_98 = arith.constant 0 : index
    %c0_99 = arith.constant 0 : index
    %c0_100 = arith.constant 0 : index
    %c0_101 = arith.constant 0 : index
    %165 = vector.load %arg5[%c0_98, %c0_99, %c0_100, %c0_101] : memref<1x2x4x10xf32, #tpu.memory_space<vmem>>, vector<1x1x4x10xf32>
    %166 = vector.shape_cast %165 : vector<1x1x4x10xf32> to vector<4x10xf32>
    %167 = vector.shape_cast %161 : vector<4x10xf32> to vector<1x1x4x10xf32>
    tpu.vector_store %arg5[%c0_98, %c0_99, %c0_100, %c0_101], %167 {strides = array<i32>} : memref<1x2x4x10xf32, #tpu.memory_space<vmem>>, vector<1x1x4x10xf32>,
    %c0_102 = arith.constant 0 : index
    %c1_103 = arith.constant 1 : index
    %c0_104 = arith.constant 0 : index
    %c0_105 = arith.constant 0 : index
    %168 = vector.load %arg5[%c0_102, %c1_103, %c0_104, %c0_105] : memref<1x2x4x10xf32, #tpu.memory_space<vmem>>, vector<1x1x4x10xf32>
    %169 = vector.shape_cast %168 : vector<1x1x4x10xf32> to vector<4x10xf32>
    %170 = vector.shape_cast %164 : vector<4x10xf32> to vector<1x1x4x10xf32>
    tpu.vector_store %arg5[%c0_102, %c1_103, %c0_104, %c0_105], %170 {strides = array<i32>} : memref<1x2x4x10xf32, #tpu.memory_space<vmem>>, vector<1x1x4x10xf32>,
    %171 = tpu.iota {dimensions = array<i32: 1>} : vector<4x5xi32>
    %c2_i32_106 = arith.constant 2 : i32
    %172 = arith.muli %c2_i32_106, %arg1 : i32
    %c1_i32_107 = arith.constant 1 : i32
    %173 = arith.addi %172, %c1_i32_107 : i32
    %c10_i32 = arith.constant 10 : i32
    %174 = arith.cmpi slt, %173, %c10_i32 : i32
    %175 = arith.extui %174 : i1 to i32
    %176 = arith.sitofp %175 : i32 to f32
    %cst_108 = arith.constant 0.000000e+00 : f32
    %177 = vector.broadcast %cst_108 : f32 to vector<4x1xf32>
    %cst_109 = arith.constant 0.000000e+00 : f32
    %178 = vector.broadcast %cst_109 : f32 to vector<4x1xf32>
    %c5_i32 = arith.constant 5 : i32
    %179 = vector.broadcast %c5_i32 : i32 to vector<4x5xi32>
    %180 = arith.cmpi slt, %171, %179 : vector<4x5xi32>
    %181 = arith.extui %180 : vector<4x5xi1> to vector<4x5xi32>
    %182 = arith.sitofp %181 : vector<4x5xi32> to vector<4x5xf32>
    %183 = arith.mulf %33, %182 : vector<4x5xf32>
    %cst_110 = arith.constant dense<0.000000e+00> : vector<4xf32>
    %184 = vector.multi_reduction <add>, %183, %cst_110 [1] : vector<4x5xf32> to vector<4xf32>
    %185 = vector.shape_cast %184 : vector<4xf32> to vector<4x1xf32>
    %186 = arith.addf %177, %185 : vector<4x1xf32>
    %187 = arith.mulf %183, %183 : vector<4x5xf32>
    %cst_111 = arith.constant dense<0.000000e+00> : vector<4xf32>
    %188 = vector.multi_reduction <add>, %187, %cst_111 [1] : vector<4x5xf32> to vector<4xf32>
    %189 = vector.shape_cast %188 : vector<4xf32> to vector<4x1xf32>
    %190 = arith.addf %178, %189 : vector<4x1xf32>
    %c5_i32_112 = arith.constant 5 : i32
    %191 = vector.broadcast %c5_i32_112 : i32 to vector<4x5xi32>
    %192 = arith.cmpi slt, %171, %191 : vector<4x5xi32>
    %193 = arith.extui %192 : vector<4x5xi1> to vector<4x5xi32>
    %194 = arith.sitofp %193 : vector<4x5xi32> to vector<4x5xf32>
    %195 = arith.mulf %65, %194 : vector<4x5xf32>
    %cst_113 = arith.constant dense<0.000000e+00> : vector<4xf32>
    %196 = vector.multi_reduction <add>, %195, %cst_113 [1] : vector<4x5xf32> to vector<4xf32>
    %197 = vector.shape_cast %196 : vector<4xf32> to vector<4x1xf32>
    %198 = arith.addf %186, %197 : vector<4x1xf32>
    %199 = arith.mulf %195, %195 : vector<4x5xf32>
    %cst_114 = arith.constant dense<0.000000e+00> : vector<4xf32>
    %200 = vector.multi_reduction <add>, %199, %cst_114 [1] : vector<4x5xf32> to vector<4xf32>
    %201 = vector.shape_cast %200 : vector<4xf32> to vector<4x1xf32>
    %202 = arith.addf %190, %201 : vector<4x1xf32>
    %c5_i32_115 = arith.constant 5 : i32
    %203 = vector.broadcast %c5_i32_115 : i32 to vector<4x5xi32>
    %204 = arith.cmpi slt, %171, %203 : vector<4x5xi32>
    %205 = arith.extui %204 : vector<4x5xi1> to vector<4x5xi32>
    %206 = arith.sitofp %205 : vector<4x5xi32> to vector<4x5xf32>
    %207 = vector.broadcast %176 : f32 to vector<4x5xf32>
    %208 = arith.mulf %206, %207 : vector<4x5xf32>
    %209 = arith.mulf %97, %208 : vector<4x5xf32>
    %cst_116 = arith.constant dense<0.000000e+00> : vector<4xf32>
    %210 = vector.multi_reduction <add>, %209, %cst_116 [1] : vector<4x5xf32> to vector<4xf32>
    %211 = vector.shape_cast %210 : vector<4xf32> to vector<4x1xf32>
    %212 = arith.addf %198, %211 : vector<4x1xf32>
    %213 = arith.mulf %209, %209 : vector<4x5xf32>
    %cst_117 = arith.constant dense<0.000000e+00> : vector<4xf32>
    %214 = vector.multi_reduction <add>, %213, %cst_117 [1] : vector<4x5xf32> to vector<4xf32>
    %215 = vector.shape_cast %214 : vector<4xf32> to vector<4x1xf32>
    %216 = arith.addf %202, %215 : vector<4x1xf32>
    %c5_i32_118 = arith.constant 5 : i32
    %217 = vector.broadcast %c5_i32_118 : i32 to vector<4x5xi32>
    %218 = arith.cmpi slt, %171, %217 : vector<4x5xi32>
    %219 = arith.extui %218 : vector<4x5xi1> to vector<4x5xi32>
    %220 = arith.sitofp %219 : vector<4x5xi32> to vector<4x5xf32>
    %221 = vector.broadcast %176 : f32 to vector<4x5xf32>
    %222 = arith.mulf %220, %221 : vector<4x5xf32>
    %223 = arith.mulf %144, %222 : vector<4x5xf32>
    %cst_119 = arith.constant dense<0.000000e+00> : vector<4xf32>
    %224 = vector.multi_reduction <add>, %223, %cst_119 [1] : vector<4x5xf32> to vector<4xf32>
    %225 = vector.shape_cast %224 : vector<4xf32> to vector<4x1xf32>
    %226 = arith.addf %212, %225 : vector<4x1xf32>
    %227 = arith.mulf %223, %223 : vector<4x5xf32>
    %cst_120 = arith.constant dense<0.000000e+00> : vector<4xf32>
    %228 = vector.multi_reduction <add>, %227, %cst_120 [1] : vector<4x5xf32> to vector<4xf32>
    %229 = vector.shape_cast %228 : vector<4xf32> to vector<4x1xf32>
    %230 = arith.addf %216, %229 : vector<4x1xf32>
    %c0_121 = arith.constant 0 : index
    %c0_122 = arith.constant 0 : index
    %c0_123 = arith.constant 0 : index
    %c0_124 = arith.constant 0 : index
    %231 = vector.load %arg6[%c0_121, %c0_122, %c0_123, %c0_124] : memref<1x1x4x2xf32, #tpu.memory_space<vmem>>, vector<1x1x4x1xf32>
    %232 = vector.shape_cast %231 : vector<1x1x4x1xf32> to vector<4x1xf32>
    %233 = vector.shape_cast %226 : vector<4x1xf32> to vector<1x1x4x1xf32>
    tpu.vector_store %arg6[%c0_121, %c0_122, %c0_123, %c0_124], %233 {strides = array<i32>} : memref<1x1x4x2xf32, #tpu.memory_space<vmem>>, vector<1x1x4x1xf32>,
    %c0_125 = arith.constant 0 : index
    %c0_126 = arith.constant 0 : index
    %c0_127 = arith.constant 0 : index
    %c1_128 = arith.constant 1 : index
    %234 = vector.load %arg6[%c0_125, %c0_126, %c0_127, %c1_128] : memref<1x1x4x2xf32, #tpu.memory_space<vmem>>, vector<1x1x4x1xf32>
    %235 = vector.shape_cast %234 : vector<1x1x4x1xf32> to vector<4x1xf32>
    %236 = vector.shape_cast %230 : vector<4x1xf32> to vector<1x1x4x1xf32>
    tpu.vector_store %arg6[%c0_125, %c0_126, %c0_127, %c1_128], %236 {strides = array<i32>} : memref<1x1x4x2xf32, #tpu.memory_space<vmem>>, vector<1x1x4x1xf32>,
    return
  }
  func.func @transform_0(%arg0: i32, %arg1: i32) -> (i32, i32, i32, i32) {
    %c0_i32 = arith.constant 0 : i32
    %c0_i32_0 = arith.constant 0 : i32
    %c0_i32_1 = arith.constant 0 : i32
    %c0_i32_2 = arith.constant 0 : i32
    return %arg0, %c0_i32, %c0_i32_0, %c0_i32_1 : i32, i32, i32, i32
  }
  func.func @transform_1(%arg0: i32, %arg1: i32) -> (i32, i32, i32) {
    %c0_i32 = arith.constant 0 : i32
    %c0_i32_0 = arith.constant 0 : i32
    %c0_i32_1 = arith.constant 0 : i32
    %c0_i32_2 = arith.constant 0 : i32
    return %c0_i32, %c0_i32_0, %c0_i32_1 : i32, i32, i32
  }
  func.func @transform_2(%arg0: i32, %arg1: i32) -> (i32, i32) {
    %c0_i32 = arith.constant 0 : i32
    %c0_i32_0 = arith.constant 0 : i32
    %c0_i32_1 = arith.constant 0 : i32
    return %c0_i32, %c0_i32_0 : i32, i32
  }
  func.func @transform_3(%arg0: i32, %arg1: i32) -> (i32, i32, i32, i32) {
    %c0_i32 = arith.constant 0 : i32
    %c0_i32_0 = arith.constant 0 : i32
    %c0_i32_1 = arith.constant 0 : i32
    return %arg0, %arg1, %c0_i32, %c0_i32_0 : i32, i32, i32, i32
  }
  func.func @transform_4(%arg0: i32, %arg1: i32) -> (i32, i32, i32, i32) {
    %c0_i32 = arith.constant 0 : i32
    %c0_i32_0 = arith.constant 0 : i32
    %c0_i32_1 = arith.constant 0 : i32
    return %arg0, %arg1, %c0_i32, %c0_i32_0 : i32, i32, i32, i32
  }
}

module attributes {stable_mosaic.version = 11 : i64} {
  func.func @kernel(%arg0: i32, %arg1: i32, %arg2: memref<1x13x4x13xbf16, #tpu.memory_space<vmem>>, %arg3: memref<36x3x4xbf16, #tpu.memory_space<vmem>>, %arg4: memref<3x1xf32, #tpu.memory_space<vmem>>, %arg5: memref<1x2x3x22xf32, #tpu.memory_space<vmem>>) attributes {dimension_semantics = [#tpu.dimension_semantics<parallel>, #tpu.dimension_semantics<parallel>], iteration_bounds = array<i64: 2, 11>, scalar_prefetch = 0 : i64, scratch_operands = 0 : i64, tpu.core_type = #tpu.core_type<tc>, window_params = [{transform_indices = @transform_0, window_bounds = array<i64: 1, 13, 4, 13>}, {pipeline_mode = #tpu.pipeline_mode<synchronous>, transform_indices = @transform_1, window_bounds = array<i64: 36, 3, 4>}, {pipeline_mode = #tpu.pipeline_mode<synchronous>, transform_indices = @transform_2, window_bounds = array<i64: 3, 1>}, {transform_indices = @transform_3, window_bounds = array<i64: 1, 2, 3, 22>}]} {
    %c0_i32 = arith.constant 0 : i32
    %0 = arith.addi %arg1, %c0_i32 : i32
    %c0 = arith.constant 0 : index
    %1 = arith.index_cast %0 : i32 to index
    %c0_0 = arith.constant 0 : index
    %c0_1 = arith.constant 0 : index
    %2 = vector.load %arg2[%c0, %1, %c0_0, %c0_1] : memref<1x13x4x13xbf16, #tpu.memory_space<vmem>>, vector<1x1x4x13xbf16>
    %3 = vector.shape_cast %2 : vector<1x1x4x13xbf16> to vector<4x13xbf16>
    %c1_i32 = arith.constant 1 : i32
    %4 = arith.addi %arg1, %c1_i32 : i32
    %c0_2 = arith.constant 0 : index
    %5 = arith.index_cast %4 : i32 to index
    %c0_3 = arith.constant 0 : index
    %c0_4 = arith.constant 0 : index
    %6 = vector.load %arg2[%c0_2, %5, %c0_3, %c0_4] : memref<1x13x4x13xbf16, #tpu.memory_space<vmem>>, vector<1x1x4x13xbf16>
    %7 = vector.shape_cast %6 : vector<1x1x4x13xbf16> to vector<4x13xbf16>
    %c2_i32 = arith.constant 2 : i32
    %8 = arith.addi %arg1, %c2_i32 : i32
    %c0_5 = arith.constant 0 : index
    %9 = arith.index_cast %8 : i32 to index
    %c0_6 = arith.constant 0 : index
    %c0_7 = arith.constant 0 : index
    %10 = vector.load %arg2[%c0_5, %9, %c0_6, %c0_7] : memref<1x13x4x13xbf16, #tpu.memory_space<vmem>>, vector<1x1x4x13xbf16>
    %11 = vector.shape_cast %10 : vector<1x1x4x13xbf16> to vector<4x13xbf16>
    %12 = vector.extract_strided_slice %3 {offsets = [0, 0], sizes = [4, 11], strides = [1, 1]} : vector<4x13xbf16> to vector<4x11xbf16>
    %c0_8 = arith.constant 0 : index
    %c0_9 = arith.constant 0 : index
    %c0_10 = arith.constant 0 : index
    %13 = vector.load %arg3[%c0_8, %c0_9, %c0_10] : memref<36x3x4xbf16, #tpu.memory_space<vmem>>, vector<1x3x4xbf16>
    %14 = vector.shape_cast %13 : vector<1x3x4xbf16> to vector<3x4xbf16>
    %cst = arith.constant dense<0.000000e+00> : vector<3x11xf32>
    %15 = tpu.matmul %14, %12, %cst {dimension_numbers = #tpu.dot_dimension_numbers<[1], [0], [0], [1], [0, 0, 1, 1], [], []>} : vector<3x4xbf16>, vector<4x11xbf16>, vector<3x11xf32> -> vector<3x11xf32>
    %16 = vector.extract_strided_slice %3 {offsets = [0, 1], sizes = [4, 11], strides = [1, 1]} : vector<4x13xbf16> to vector<4x11xbf16>
    %c1 = arith.constant 1 : index
    %c0_11 = arith.constant 0 : index
    %c0_12 = arith.constant 0 : index
    %17 = vector.load %arg3[%c1, %c0_11, %c0_12] : memref<36x3x4xbf16, #tpu.memory_space<vmem>>, vector<1x3x4xbf16>
    %18 = vector.shape_cast %17 : vector<1x3x4xbf16> to vector<3x4xbf16>
    %cst_13 = arith.constant dense<0.000000e+00> : vector<3x11xf32>
    %19 = tpu.matmul %18, %16, %cst_13 {dimension_numbers = #tpu.dot_dimension_numbers<[1], [0], [0], [1], [0, 0, 1, 1], [], []>} : vector<3x4xbf16>, vector<4x11xbf16>, vector<3x11xf32> -> vector<3x11xf32>
    %20 = arith.addf %15, %19 : vector<3x11xf32>
    %21 = vector.extract_strided_slice %7 {offsets = [0, 0], sizes = [4, 11], strides = [1, 1]} : vector<4x13xbf16> to vector<4x11xbf16>
    %c3 = arith.constant 3 : index
    %c0_14 = arith.constant 0 : index
    %c0_15 = arith.constant 0 : index
    %22 = vector.load %arg3[%c3, %c0_14, %c0_15] : memref<36x3x4xbf16, #tpu.memory_space<vmem>>, vector<1x3x4xbf16>
    %23 = vector.shape_cast %22 : vector<1x3x4xbf16> to vector<3x4xbf16>
    %cst_16 = arith.constant dense<0.000000e+00> : vector<3x11xf32>
    %24 = tpu.matmul %23, %21, %cst_16 {dimension_numbers = #tpu.dot_dimension_numbers<[1], [0], [0], [1], [0, 0, 1, 1], [], []>} : vector<3x4xbf16>, vector<4x11xbf16>, vector<3x11xf32> -> vector<3x11xf32>
    %25 = arith.addf %20, %24 : vector<3x11xf32>
    %26 = vector.extract_strided_slice %7 {offsets = [0, 1], sizes = [4, 11], strides = [1, 1]} : vector<4x13xbf16> to vector<4x11xbf16>
    %c4 = arith.constant 4 : index
    %c0_17 = arith.constant 0 : index
    %c0_18 = arith.constant 0 : index
    %27 = vector.load %arg3[%c4, %c0_17, %c0_18] : memref<36x3x4xbf16, #tpu.memory_space<vmem>>, vector<1x3x4xbf16>
    %28 = vector.shape_cast %27 : vector<1x3x4xbf16> to vector<3x4xbf16>
    %cst_19 = arith.constant dense<0.000000e+00> : vector<3x11xf32>
    %29 = tpu.matmul %28, %26, %cst_19 {dimension_numbers = #tpu.dot_dimension_numbers<[1], [0], [0], [1], [0, 0, 1, 1], [], []>} : vector<3x4xbf16>, vector<4x11xbf16>, vector<3x11xf32> -> vector<3x11xf32>
    %30 = arith.addf %25, %29 : vector<3x11xf32>
    %c0_20 = arith.constant 0 : index
    %c0_21 = arith.constant 0 : index
    %31 = vector.load %arg4[%c0_20, %c0_21] : memref<3x1xf32, #tpu.memory_space<vmem>>, vector<3x1xf32>
    %32 = vector.broadcast %31 : vector<3x1xf32> to vector<3x11xf32>
    %33 = arith.addf %30, %32 : vector<3x11xf32>
    %34 = vector.extract_strided_slice %3 {offsets = [0, 0], sizes = [4, 11], strides = [1, 1]} : vector<4x13xbf16> to vector<4x11xbf16>
    %c9 = arith.constant 9 : index
    %c0_22 = arith.constant 0 : index
    %c0_23 = arith.constant 0 : index
    %35 = vector.load %arg3[%c9, %c0_22, %c0_23] : memref<36x3x4xbf16, #tpu.memory_space<vmem>>, vector<1x3x4xbf16>
    %36 = vector.shape_cast %35 : vector<1x3x4xbf16> to vector<3x4xbf16>
    %cst_24 = arith.constant dense<0.000000e+00> : vector<3x11xf32>
    %37 = tpu.matmul %36, %34, %cst_24 {dimension_numbers = #tpu.dot_dimension_numbers<[1], [0], [0], [1], [0, 0, 1, 1], [], []>} : vector<3x4xbf16>, vector<4x11xbf16>, vector<3x11xf32> -> vector<3x11xf32>
    %38 = vector.extract_strided_slice %3 {offsets = [0, 1], sizes = [4, 11], strides = [1, 1]} : vector<4x13xbf16> to vector<4x11xbf16>
    %c10 = arith.constant 10 : index
    %c0_25 = arith.constant 0 : index
    %c0_26 = arith.constant 0 : index
    %39 = vector.load %arg3[%c10, %c0_25, %c0_26] : memref<36x3x4xbf16, #tpu.memory_space<vmem>>, vector<1x3x4xbf16>
    %40 = vector.shape_cast %39 : vector<1x3x4xbf16> to vector<3x4xbf16>
    %cst_27 = arith.constant dense<0.000000e+00> : vector<3x11xf32>
    %41 = tpu.matmul %40, %38, %cst_27 {dimension_numbers = #tpu.dot_dimension_numbers<[1], [0], [0], [1], [0, 0, 1, 1], [], []>} : vector<3x4xbf16>, vector<4x11xbf16>, vector<3x11xf32> -> vector<3x11xf32>
    %42 = arith.addf %37, %41 : vector<3x11xf32>
    %43 = vector.extract_strided_slice %3 {offsets = [0, 2], sizes = [4, 11], strides = [1, 1]} : vector<4x13xbf16> to vector<4x11xbf16>
    %c11 = arith.constant 11 : index
    %c0_28 = arith.constant 0 : index
    %c0_29 = arith.constant 0 : index
    %44 = vector.load %arg3[%c11, %c0_28, %c0_29] : memref<36x3x4xbf16, #tpu.memory_space<vmem>>, vector<1x3x4xbf16>
    %45 = vector.shape_cast %44 : vector<1x3x4xbf16> to vector<3x4xbf16>
    %cst_30 = arith.constant dense<0.000000e+00> : vector<3x11xf32>
    %46 = tpu.matmul %45, %43, %cst_30 {dimension_numbers = #tpu.dot_dimension_numbers<[1], [0], [0], [1], [0, 0, 1, 1], [], []>} : vector<3x4xbf16>, vector<4x11xbf16>, vector<3x11xf32> -> vector<3x11xf32>
    %47 = arith.addf %42, %46 : vector<3x11xf32>
    %48 = vector.extract_strided_slice %7 {offsets = [0, 0], sizes = [4, 11], strides = [1, 1]} : vector<4x13xbf16> to vector<4x11xbf16>
    %c12 = arith.constant 12 : index
    %c0_31 = arith.constant 0 : index
    %c0_32 = arith.constant 0 : index
    %49 = vector.load %arg3[%c12, %c0_31, %c0_32] : memref<36x3x4xbf16, #tpu.memory_space<vmem>>, vector<1x3x4xbf16>
    %50 = vector.shape_cast %49 : vector<1x3x4xbf16> to vector<3x4xbf16>
    %cst_33 = arith.constant dense<0.000000e+00> : vector<3x11xf32>
    %51 = tpu.matmul %50, %48, %cst_33 {dimension_numbers = #tpu.dot_dimension_numbers<[1], [0], [0], [1], [0, 0, 1, 1], [], []>} : vector<3x4xbf16>, vector<4x11xbf16>, vector<3x11xf32> -> vector<3x11xf32>
    %52 = arith.addf %47, %51 : vector<3x11xf32>
    %53 = vector.extract_strided_slice %7 {offsets = [0, 1], sizes = [4, 11], strides = [1, 1]} : vector<4x13xbf16> to vector<4x11xbf16>
    %c13 = arith.constant 13 : index
    %c0_34 = arith.constant 0 : index
    %c0_35 = arith.constant 0 : index
    %54 = vector.load %arg3[%c13, %c0_34, %c0_35] : memref<36x3x4xbf16, #tpu.memory_space<vmem>>, vector<1x3x4xbf16>
    %55 = vector.shape_cast %54 : vector<1x3x4xbf16> to vector<3x4xbf16>
    %cst_36 = arith.constant dense<0.000000e+00> : vector<3x11xf32>
    %56 = tpu.matmul %55, %53, %cst_36 {dimension_numbers = #tpu.dot_dimension_numbers<[1], [0], [0], [1], [0, 0, 1, 1], [], []>} : vector<3x4xbf16>, vector<4x11xbf16>, vector<3x11xf32> -> vector<3x11xf32>
    %57 = arith.addf %52, %56 : vector<3x11xf32>
    %58 = vector.extract_strided_slice %7 {offsets = [0, 2], sizes = [4, 11], strides = [1, 1]} : vector<4x13xbf16> to vector<4x11xbf16>
    %c14 = arith.constant 14 : index
    %c0_37 = arith.constant 0 : index
    %c0_38 = arith.constant 0 : index
    %59 = vector.load %arg3[%c14, %c0_37, %c0_38] : memref<36x3x4xbf16, #tpu.memory_space<vmem>>, vector<1x3x4xbf16>
    %60 = vector.shape_cast %59 : vector<1x3x4xbf16> to vector<3x4xbf16>
    %cst_39 = arith.constant dense<0.000000e+00> : vector<3x11xf32>
    %61 = tpu.matmul %60, %58, %cst_39 {dimension_numbers = #tpu.dot_dimension_numbers<[1], [0], [0], [1], [0, 0, 1, 1], [], []>} : vector<3x4xbf16>, vector<4x11xbf16>, vector<3x11xf32> -> vector<3x11xf32>
    %62 = arith.addf %57, %61 : vector<3x11xf32>
    %c0_40 = arith.constant 0 : index
    %c0_41 = arith.constant 0 : index
    %63 = vector.load %arg4[%c0_40, %c0_41] : memref<3x1xf32, #tpu.memory_space<vmem>>, vector<3x1xf32>
    %64 = vector.broadcast %63 : vector<3x1xf32> to vector<3x11xf32>
    %65 = arith.addf %62, %64 : vector<3x11xf32>
    %66 = vector.extract_strided_slice %3 {offsets = [0, 0], sizes = [4, 11], strides = [1, 1]} : vector<4x13xbf16> to vector<4x11xbf16>
    %c18 = arith.constant 18 : index
    %c0_42 = arith.constant 0 : index
    %c0_43 = arith.constant 0 : index
    %67 = vector.load %arg3[%c18, %c0_42, %c0_43] : memref<36x3x4xbf16, #tpu.memory_space<vmem>>, vector<1x3x4xbf16>
    %68 = vector.shape_cast %67 : vector<1x3x4xbf16> to vector<3x4xbf16>
    %cst_44 = arith.constant dense<0.000000e+00> : vector<3x11xf32>
    %69 = tpu.matmul %68, %66, %cst_44 {dimension_numbers = #tpu.dot_dimension_numbers<[1], [0], [0], [1], [0, 0, 1, 1], [], []>} : vector<3x4xbf16>, vector<4x11xbf16>, vector<3x11xf32> -> vector<3x11xf32>
    %70 = vector.extract_strided_slice %3 {offsets = [0, 1], sizes = [4, 11], strides = [1, 1]} : vector<4x13xbf16> to vector<4x11xbf16>
    %c19 = arith.constant 19 : index
    %c0_45 = arith.constant 0 : index
    %c0_46 = arith.constant 0 : index
    %71 = vector.load %arg3[%c19, %c0_45, %c0_46] : memref<36x3x4xbf16, #tpu.memory_space<vmem>>, vector<1x3x4xbf16>
    %72 = vector.shape_cast %71 : vector<1x3x4xbf16> to vector<3x4xbf16>
    %cst_47 = arith.constant dense<0.000000e+00> : vector<3x11xf32>
    %73 = tpu.matmul %72, %70, %cst_47 {dimension_numbers = #tpu.dot_dimension_numbers<[1], [0], [0], [1], [0, 0, 1, 1], [], []>} : vector<3x4xbf16>, vector<4x11xbf16>, vector<3x11xf32> -> vector<3x11xf32>
    %74 = arith.addf %69, %73 : vector<3x11xf32>
    %75 = vector.extract_strided_slice %7 {offsets = [0, 0], sizes = [4, 11], strides = [1, 1]} : vector<4x13xbf16> to vector<4x11xbf16>
    %c21 = arith.constant 21 : index
    %c0_48 = arith.constant 0 : index
    %c0_49 = arith.constant 0 : index
    %76 = vector.load %arg3[%c21, %c0_48, %c0_49] : memref<36x3x4xbf16, #tpu.memory_space<vmem>>, vector<1x3x4xbf16>
    %77 = vector.shape_cast %76 : vector<1x3x4xbf16> to vector<3x4xbf16>
    %cst_50 = arith.constant dense<0.000000e+00> : vector<3x11xf32>
    %78 = tpu.matmul %77, %75, %cst_50 {dimension_numbers = #tpu.dot_dimension_numbers<[1], [0], [0], [1], [0, 0, 1, 1], [], []>} : vector<3x4xbf16>, vector<4x11xbf16>, vector<3x11xf32> -> vector<3x11xf32>
    %79 = arith.addf %74, %78 : vector<3x11xf32>
    %80 = vector.extract_strided_slice %7 {offsets = [0, 1], sizes = [4, 11], strides = [1, 1]} : vector<4x13xbf16> to vector<4x11xbf16>
    %c22 = arith.constant 22 : index
    %c0_51 = arith.constant 0 : index
    %c0_52 = arith.constant 0 : index
    %81 = vector.load %arg3[%c22, %c0_51, %c0_52] : memref<36x3x4xbf16, #tpu.memory_space<vmem>>, vector<1x3x4xbf16>
    %82 = vector.shape_cast %81 : vector<1x3x4xbf16> to vector<3x4xbf16>
    %cst_53 = arith.constant dense<0.000000e+00> : vector<3x11xf32>
    %83 = tpu.matmul %82, %80, %cst_53 {dimension_numbers = #tpu.dot_dimension_numbers<[1], [0], [0], [1], [0, 0, 1, 1], [], []>} : vector<3x4xbf16>, vector<4x11xbf16>, vector<3x11xf32> -> vector<3x11xf32>
    %84 = arith.addf %79, %83 : vector<3x11xf32>
    %85 = vector.extract_strided_slice %11 {offsets = [0, 0], sizes = [4, 11], strides = [1, 1]} : vector<4x13xbf16> to vector<4x11xbf16>
    %c24 = arith.constant 24 : index
    %c0_54 = arith.constant 0 : index
    %c0_55 = arith.constant 0 : index
    %86 = vector.load %arg3[%c24, %c0_54, %c0_55] : memref<36x3x4xbf16, #tpu.memory_space<vmem>>, vector<1x3x4xbf16>
    %87 = vector.shape_cast %86 : vector<1x3x4xbf16> to vector<3x4xbf16>
    %cst_56 = arith.constant dense<0.000000e+00> : vector<3x11xf32>
    %88 = tpu.matmul %87, %85, %cst_56 {dimension_numbers = #tpu.dot_dimension_numbers<[1], [0], [0], [1], [0, 0, 1, 1], [], []>} : vector<3x4xbf16>, vector<4x11xbf16>, vector<3x11xf32> -> vector<3x11xf32>
    %89 = arith.addf %84, %88 : vector<3x11xf32>
    %90 = vector.extract_strided_slice %11 {offsets = [0, 1], sizes = [4, 11], strides = [1, 1]} : vector<4x13xbf16> to vector<4x11xbf16>
    %c25 = arith.constant 25 : index
    %c0_57 = arith.constant 0 : index
    %c0_58 = arith.constant 0 : index
    %91 = vector.load %arg3[%c25, %c0_57, %c0_58] : memref<36x3x4xbf16, #tpu.memory_space<vmem>>, vector<1x3x4xbf16>
    %92 = vector.shape_cast %91 : vector<1x3x4xbf16> to vector<3x4xbf16>
    %cst_59 = arith.constant dense<0.000000e+00> : vector<3x11xf32>
    %93 = tpu.matmul %92, %90, %cst_59 {dimension_numbers = #tpu.dot_dimension_numbers<[1], [0], [0], [1], [0, 0, 1, 1], [], []>} : vector<3x4xbf16>, vector<4x11xbf16>, vector<3x11xf32> -> vector<3x11xf32>
    %94 = arith.addf %89, %93 : vector<3x11xf32>
    %c0_60 = arith.constant 0 : index
    %c0_61 = arith.constant 0 : index
    %95 = vector.load %arg4[%c0_60, %c0_61] : memref<3x1xf32, #tpu.memory_space<vmem>>, vector<3x1xf32>
    %96 = vector.broadcast %95 : vector<3x1xf32> to vector<3x11xf32>
    %97 = arith.addf %94, %96 : vector<3x11xf32>
    %98 = vector.extract_strided_slice %3 {offsets = [0, 0], sizes = [4, 11], strides = [1, 1]} : vector<4x13xbf16> to vector<4x11xbf16>
    %c27 = arith.constant 27 : index
    %c0_62 = arith.constant 0 : index
    %c0_63 = arith.constant 0 : index
    %99 = vector.load %arg3[%c27, %c0_62, %c0_63] : memref<36x3x4xbf16, #tpu.memory_space<vmem>>, vector<1x3x4xbf16>
    %100 = vector.shape_cast %99 : vector<1x3x4xbf16> to vector<3x4xbf16>
    %cst_64 = arith.constant dense<0.000000e+00> : vector<3x11xf32>
    %101 = tpu.matmul %100, %98, %cst_64 {dimension_numbers = #tpu.dot_dimension_numbers<[1], [0], [0], [1], [0, 0, 1, 1], [], []>} : vector<3x4xbf16>, vector<4x11xbf16>, vector<3x11xf32> -> vector<3x11xf32>
    %102 = vector.extract_strided_slice %3 {offsets = [0, 1], sizes = [4, 11], strides = [1, 1]} : vector<4x13xbf16> to vector<4x11xbf16>
    %c28 = arith.constant 28 : index
    %c0_65 = arith.constant 0 : index
    %c0_66 = arith.constant 0 : index
    %103 = vector.load %arg3[%c28, %c0_65, %c0_66] : memref<36x3x4xbf16, #tpu.memory_space<vmem>>, vector<1x3x4xbf16>
    %104 = vector.shape_cast %103 : vector<1x3x4xbf16> to vector<3x4xbf16>
    %cst_67 = arith.constant dense<0.000000e+00> : vector<3x11xf32>
    %105 = tpu.matmul %104, %102, %cst_67 {dimension_numbers = #tpu.dot_dimension_numbers<[1], [0], [0], [1], [0, 0, 1, 1], [], []>} : vector<3x4xbf16>, vector<4x11xbf16>, vector<3x11xf32> -> vector<3x11xf32>
    %106 = arith.addf %101, %105 : vector<3x11xf32>
    %107 = vector.extract_strided_slice %3 {offsets = [0, 2], sizes = [4, 11], strides = [1, 1]} : vector<4x13xbf16> to vector<4x11xbf16>
    %c29 = arith.constant 29 : index
    %c0_68 = arith.constant 0 : index
    %c0_69 = arith.constant 0 : index
    %108 = vector.load %arg3[%c29, %c0_68, %c0_69] : memref<36x3x4xbf16, #tpu.memory_space<vmem>>, vector<1x3x4xbf16>
    %109 = vector.shape_cast %108 : vector<1x3x4xbf16> to vector<3x4xbf16>
    %cst_70 = arith.constant dense<0.000000e+00> : vector<3x11xf32>
    %110 = tpu.matmul %109, %107, %cst_70 {dimension_numbers = #tpu.dot_dimension_numbers<[1], [0], [0], [1], [0, 0, 1, 1], [], []>} : vector<3x4xbf16>, vector<4x11xbf16>, vector<3x11xf32> -> vector<3x11xf32>
    %111 = arith.addf %106, %110 : vector<3x11xf32>
    %112 = vector.extract_strided_slice %7 {offsets = [0, 0], sizes = [4, 11], strides = [1, 1]} : vector<4x13xbf16> to vector<4x11xbf16>
    %c30 = arith.constant 30 : index
    %c0_71 = arith.constant 0 : index
    %c0_72 = arith.constant 0 : index
    %113 = vector.load %arg3[%c30, %c0_71, %c0_72] : memref<36x3x4xbf16, #tpu.memory_space<vmem>>, vector<1x3x4xbf16>
    %114 = vector.shape_cast %113 : vector<1x3x4xbf16> to vector<3x4xbf16>
    %cst_73 = arith.constant dense<0.000000e+00> : vector<3x11xf32>
    %115 = tpu.matmul %114, %112, %cst_73 {dimension_numbers = #tpu.dot_dimension_numbers<[1], [0], [0], [1], [0, 0, 1, 1], [], []>} : vector<3x4xbf16>, vector<4x11xbf16>, vector<3x11xf32> -> vector<3x11xf32>
    %116 = arith.addf %111, %115 : vector<3x11xf32>
    %117 = vector.extract_strided_slice %7 {offsets = [0, 1], sizes = [4, 11], strides = [1, 1]} : vector<4x13xbf16> to vector<4x11xbf16>
    %c31 = arith.constant 31 : index
    %c0_74 = arith.constant 0 : index
    %c0_75 = arith.constant 0 : index
    %118 = vector.load %arg3[%c31, %c0_74, %c0_75] : memref<36x3x4xbf16, #tpu.memory_space<vmem>>, vector<1x3x4xbf16>
    %119 = vector.shape_cast %118 : vector<1x3x4xbf16> to vector<3x4xbf16>
    %cst_76 = arith.constant dense<0.000000e+00> : vector<3x11xf32>
    %120 = tpu.matmul %119, %117, %cst_76 {dimension_numbers = #tpu.dot_dimension_numbers<[1], [0], [0], [1], [0, 0, 1, 1], [], []>} : vector<3x4xbf16>, vector<4x11xbf16>, vector<3x11xf32> -> vector<3x11xf32>
    %121 = arith.addf %116, %120 : vector<3x11xf32>
    %122 = vector.extract_strided_slice %7 {offsets = [0, 2], sizes = [4, 11], strides = [1, 1]} : vector<4x13xbf16> to vector<4x11xbf16>
    %c32 = arith.constant 32 : index
    %c0_77 = arith.constant 0 : index
    %c0_78 = arith.constant 0 : index
    %123 = vector.load %arg3[%c32, %c0_77, %c0_78] : memref<36x3x4xbf16, #tpu.memory_space<vmem>>, vector<1x3x4xbf16>
    %124 = vector.shape_cast %123 : vector<1x3x4xbf16> to vector<3x4xbf16>
    %cst_79 = arith.constant dense<0.000000e+00> : vector<3x11xf32>
    %125 = tpu.matmul %124, %122, %cst_79 {dimension_numbers = #tpu.dot_dimension_numbers<[1], [0], [0], [1], [0, 0, 1, 1], [], []>} : vector<3x4xbf16>, vector<4x11xbf16>, vector<3x11xf32> -> vector<3x11xf32>
    %126 = arith.addf %121, %125 : vector<3x11xf32>
    %127 = vector.extract_strided_slice %11 {offsets = [0, 0], sizes = [4, 11], strides = [1, 1]} : vector<4x13xbf16> to vector<4x11xbf16>
    %c33 = arith.constant 33 : index
    %c0_80 = arith.constant 0 : index
    %c0_81 = arith.constant 0 : index
    %128 = vector.load %arg3[%c33, %c0_80, %c0_81] : memref<36x3x4xbf16, #tpu.memory_space<vmem>>, vector<1x3x4xbf16>
    %129 = vector.shape_cast %128 : vector<1x3x4xbf16> to vector<3x4xbf16>
    %cst_82 = arith.constant dense<0.000000e+00> : vector<3x11xf32>
    %130 = tpu.matmul %129, %127, %cst_82 {dimension_numbers = #tpu.dot_dimension_numbers<[1], [0], [0], [1], [0, 0, 1, 1], [], []>} : vector<3x4xbf16>, vector<4x11xbf16>, vector<3x11xf32> -> vector<3x11xf32>
    %131 = arith.addf %126, %130 : vector<3x11xf32>
    %132 = vector.extract_strided_slice %11 {offsets = [0, 1], sizes = [4, 11], strides = [1, 1]} : vector<4x13xbf16> to vector<4x11xbf16>
    %c34 = arith.constant 34 : index
    %c0_83 = arith.constant 0 : index
    %c0_84 = arith.constant 0 : index
    %133 = vector.load %arg3[%c34, %c0_83, %c0_84] : memref<36x3x4xbf16, #tpu.memory_space<vmem>>, vector<1x3x4xbf16>
    %134 = vector.shape_cast %133 : vector<1x3x4xbf16> to vector<3x4xbf16>
    %cst_85 = arith.constant dense<0.000000e+00> : vector<3x11xf32>
    %135 = tpu.matmul %134, %132, %cst_85 {dimension_numbers = #tpu.dot_dimension_numbers<[1], [0], [0], [1], [0, 0, 1, 1], [], []>} : vector<3x4xbf16>, vector<4x11xbf16>, vector<3x11xf32> -> vector<3x11xf32>
    %136 = arith.addf %131, %135 : vector<3x11xf32>
    %137 = vector.extract_strided_slice %11 {offsets = [0, 2], sizes = [4, 11], strides = [1, 1]} : vector<4x13xbf16> to vector<4x11xbf16>
    %c35 = arith.constant 35 : index
    %c0_86 = arith.constant 0 : index
    %c0_87 = arith.constant 0 : index
    %138 = vector.load %arg3[%c35, %c0_86, %c0_87] : memref<36x3x4xbf16, #tpu.memory_space<vmem>>, vector<1x3x4xbf16>
    %139 = vector.shape_cast %138 : vector<1x3x4xbf16> to vector<3x4xbf16>
    %cst_88 = arith.constant dense<0.000000e+00> : vector<3x11xf32>
    %140 = tpu.matmul %139, %137, %cst_88 {dimension_numbers = #tpu.dot_dimension_numbers<[1], [0], [0], [1], [0, 0, 1, 1], [], []>} : vector<3x4xbf16>, vector<4x11xbf16>, vector<3x11xf32> -> vector<3x11xf32>
    %141 = arith.addf %136, %140 : vector<3x11xf32>
    %c0_89 = arith.constant 0 : index
    %c0_90 = arith.constant 0 : index
    %142 = vector.load %arg4[%c0_89, %c0_90] : memref<3x1xf32, #tpu.memory_space<vmem>>, vector<3x1xf32>
    %143 = vector.broadcast %142 : vector<3x1xf32> to vector<3x11xf32>
    %144 = arith.addf %141, %143 : vector<3x11xf32>
    %145 = tpu.iota {dimensions = array<i32: 0>} : vector<11x22xi32>
    %146 = tpu.iota {dimensions = array<i32: 1>} : vector<11x22xi32>
    %c2_i32_91 = arith.constant 2 : i32
    %147 = vector.broadcast %c2_i32_91 : i32 to vector<11x22xi32>
    %148 = arith.muli %147, %145 : vector<11x22xi32>
    %149 = arith.cmpi eq, %146, %148 : vector<11x22xi32>
    %150 = arith.extui %149 : vector<11x22xi1> to vector<11x22xi32>
    %151 = arith.sitofp %150 : vector<11x22xi32> to vector<11x22xf32>
    %c2_i32_92 = arith.constant 2 : i32
    %152 = vector.broadcast %c2_i32_92 : i32 to vector<11x22xi32>
    %153 = arith.muli %152, %145 : vector<11x22xi32>
    %c1_i32_93 = arith.constant 1 : i32
    %154 = vector.broadcast %c1_i32_93 : i32 to vector<11x22xi32>
    %155 = arith.addi %153, %154 : vector<11x22xi32>
    %156 = arith.cmpi eq, %146, %155 : vector<11x22xi32>
    %157 = arith.extui %156 : vector<11x22xi1> to vector<11x22xi32>
    %158 = arith.sitofp %157 : vector<11x22xi32> to vector<11x22xf32>
    %cst_94 = arith.constant dense<0.000000e+00> : vector<3x22xf32>
    %159 = tpu.matmul %33, %151, %cst_94 {dimension_numbers = #tpu.dot_dimension_numbers<[1], [0], [0], [1], [0, 0, 1, 1], [], []>} : vector<3x11xf32>, vector<11x22xf32>, vector<3x22xf32> -> vector<3x22xf32>
    %cst_95 = arith.constant dense<0.000000e+00> : vector<3x22xf32>
    %160 = tpu.matmul %65, %158, %cst_95 {dimension_numbers = #tpu.dot_dimension_numbers<[1], [0], [0], [1], [0, 0, 1, 1], [], []>} : vector<3x11xf32>, vector<11x22xf32>, vector<3x22xf32> -> vector<3x22xf32>
    %161 = arith.addf %159, %160 : vector<3x22xf32>
    %cst_96 = arith.constant dense<0.000000e+00> : vector<3x22xf32>
    %162 = tpu.matmul %97, %151, %cst_96 {dimension_numbers = #tpu.dot_dimension_numbers<[1], [0], [0], [1], [0, 0, 1, 1], [], []>} : vector<3x11xf32>, vector<11x22xf32>, vector<3x22xf32> -> vector<3x22xf32>
    %cst_97 = arith.constant dense<0.000000e+00> : vector<3x22xf32>
    %163 = tpu.matmul %144, %158, %cst_97 {dimension_numbers = #tpu.dot_dimension_numbers<[1], [0], [0], [1], [0, 0, 1, 1], [], []>} : vector<3x11xf32>, vector<11x22xf32>, vector<3x22xf32> -> vector<3x22xf32>
    %164 = arith.addf %162, %163 : vector<3x22xf32>
    %165 = math.tanh %161 : vector<3x22xf32>
    %166 = math.tanh %164 : vector<3x22xf32>
    %c0_98 = arith.constant 0 : index
    %c0_99 = arith.constant 0 : index
    %c0_100 = arith.constant 0 : index
    %c0_101 = arith.constant 0 : index
    %167 = vector.load %arg5[%c0_98, %c0_99, %c0_100, %c0_101] : memref<1x2x3x22xf32, #tpu.memory_space<vmem>>, vector<1x1x3x22xf32>
    %168 = vector.shape_cast %167 : vector<1x1x3x22xf32> to vector<3x22xf32>
    %169 = vector.shape_cast %165 : vector<3x22xf32> to vector<1x1x3x22xf32>
    tpu.vector_store %arg5[%c0_98, %c0_99, %c0_100, %c0_101], %169 {strides = array<i32>} : memref<1x2x3x22xf32, #tpu.memory_space<vmem>>, vector<1x1x3x22xf32>,
    %c0_102 = arith.constant 0 : index
    %c1_103 = arith.constant 1 : index
    %c0_104 = arith.constant 0 : index
    %c0_105 = arith.constant 0 : index
    %170 = vector.load %arg5[%c0_102, %c1_103, %c0_104, %c0_105] : memref<1x2x3x22xf32, #tpu.memory_space<vmem>>, vector<1x1x3x22xf32>
    %171 = vector.shape_cast %170 : vector<1x1x3x22xf32> to vector<3x22xf32>
    %172 = vector.shape_cast %166 : vector<3x22xf32> to vector<1x1x3x22xf32>
    tpu.vector_store %arg5[%c0_102, %c1_103, %c0_104, %c0_105], %172 {strides = array<i32>} : memref<1x2x3x22xf32, #tpu.memory_space<vmem>>, vector<1x1x3x22xf32>,
    return
  }
  func.func @transform_0(%arg0: i32, %arg1: i32) -> (i32, i32, i32, i32) {
    %c0_i32 = arith.constant 0 : i32
    %c0_i32_0 = arith.constant 0 : i32
    %c0_i32_1 = arith.constant 0 : i32
    %c0_i32_2 = arith.constant 0 : i32
    return %arg0, %c0_i32, %c0_i32_0, %c0_i32_1 : i32, i32, i32, i32
  }
  func.func @transform_1(%arg0: i32, %arg1: i32) -> (i32, i32, i32) {
    %c0_i32 = arith.constant 0 : i32
    %c0_i32_0 = arith.constant 0 : i32
    %c0_i32_1 = arith.constant 0 : i32
    %c0_i32_2 = arith.constant 0 : i32
    return %c0_i32, %c0_i32_0, %c0_i32_1 : i32, i32, i32
  }
  func.func @transform_2(%arg0: i32, %arg1: i32) -> (i32, i32) {
    %c0_i32 = arith.constant 0 : i32
    %c0_i32_0 = arith.constant 0 : i32
    %c0_i32_1 = arith.constant 0 : i32
    return %c0_i32, %c0_i32_0 : i32, i32
  }
  func.func @transform_3(%arg0: i32, %arg1: i32) -> (i32, i32, i32, i32) {
    %c0_i32 = arith.constant 0 : i32
    %c0_i32_0 = arith.constant 0 : i32
    %c0_i32_1 = arith.constant 0 : i32
    return %arg0, %arg1, %c0_i32, %c0_i32_0 : i32, i32, i32, i32
  }
}

</mosaic_0001>

<bundles_post_ra>
// kernel: _lambda_.4
= control target key start
LH: loop header
LB: loop body
LE: loop exit
PB: predicated region body
PF: predicated region fallthrough
CT: control target
= control target key end

     0   :  { %s506_s12 = smov 0   ;;  %s508_s13 = smov 0   ;;  %s574_s0 = inlined_call_operand.vmem [shape: f32[2,10,4,10], index: 0, kind: input, shape index: {}]   ;;  %s575_s1 = inlined_call_operand.vmem [shape: f32[4,1], index: 1, kind: input, shape index: {}]   ;;  %s576_s2 = inlined_call_operand.vmem [shape: f32[4,1], index: 2, kind: input, shape index: {}]   ;;  %s577_s3 = inlined_call_operand.vmem [shape: bf16[2,13,4,13], index: 3, kind: output, shape index: {}]  }
   0x1   :  { %s510_s14 = smov 0   ;;  %s512_s15 = smov 0  }
   0x2   :  { %s514_s16 = smov 0  }
   0x3 LB: > { %s22_s17 = sadd.s32 1, %s474_s14  ;;  %s25_s18 = sadd.s32 1, %s478_s15  ;;  %s482_s16 = sphi %s514_s16, %s13_s16   ;;  %s478_s15 = sphi %s512_s15, %s581_s15   ;;  %s474_s14 = sphi %s510_s14, %s580_s14   ;;  %s470_s13 = sphi %s508_s13, %s579_s13   ;;  %s466_s12 = sphi %s506_s12, %s578_s12  }
   0x4   : > { %p23_p0 = scmp.ge.s32.totalorder %s22_s17, 13  ;;  %p381_p1 = scmp.ge.s32.totalorder %s482_s16, 1 }
   0x5   : > { %p176_p2 = scmp.lt.s32.totalorder %s482_s16, 27 }
   0x6   : > { %s583_s17 = smov (%p23_p0, %s22_s17), 0  ;;  %s585_s18 = smov (!%p23_p0, %s25_s18), %s478_s15 }
   0x7   : > { %p177_p3 = pnand %p381_p1, %p176_p2  ;;  %p27_p4 = scmp.ge.s32.totalorder %s585_s18, 2 }
   0x8   : > { %p216_p5 = scmp.lt.s32.totalorder (!%p177_p3), %s470_s13, 1  ;;  %p231_p6 = scmp.lt.s32.totalorder (!%p177_p3), %s466_s12, 12 }
   0x9   : > { %s587_s18 = smov (%p27_p4, %s585_s18), 0  ;;  %180 = sbr.rel (%p177_p3) target bundleno = 266 (0x10a), region = 32 }
   0xa   : > { %s382_s30 = sadd.s32 (!%p177_p3), 4294967295, %s466_s12  ;;  %p256_p10 = scmp.ge.s32.totalorder (!%p177_p3), %s466_s12, 1 }
   0xb   : > { %p212_p7 = scmp.gt.s32.totalorder (!%p177_p3), %s382_s30, 0  ;;  %p383_p8 = scmp.lt.s32.totalorder (!%p177_p3), %s382_s30, 9 }
   0xc   : > { %p257_p11 = scmp.le.s32.totalorder (!%p177_p3), %s466_s12, 10  ;;  %s485_s11 = smov (!%p177_p3), 1  }
   0xe   : > { %v239_v0 = vld [vmem:[%s575_s1] sm:$0xf]  ;;  %v484_v1 = vmov 0   ;;  %s589_s13 = smov (!%p216_p5, %s470_s13), 1  ;;  %vm264_vm0 = vcmask 99328   ;;  %s591_s30 = smov (!%p212_p7, %s382_s30), 0 }
   0xf   : > { %443 = vset.pattern.permute.xlu0 %v484_v1  ;;  %s232_s21 = scalar_select %p231_p6, %s466_s12, 12  ;;  %v246_v2 = vld [vmem:[%s576_s2] sm:$0xf]  ;;  %vm269_vm3 = vcmask 1041408   ;;  %vm277_vm4 = vcmask 82952  }
  0x10   : > { %242 = vperm.xlu0 %443, %v239_v0   ;;  %s400_s22 = smul.u32 13, %s589_s13  ;;  %s593_s30 = smov (!%p383_p8, %s591_s30), 9 }
  0x11   : > { %p218_p9 = scmp.lt.s32.totalorder %s593_s30, 9  ;;  %s399_s4 = smul.u32 10, %s589_s13 }
  0x12   : > { %s234_s23 = sadd.s32 %s400_s22, %s232_s21  ;;  %p258_p12 = pnand %p257_p11, %p256_p10 }
  0x13   : > { %s389_s24 = sshll.u32 %s234_s23, 1  ;;  %s595_s30 = smov (!%p218_p9, %s593_s30), 9 }
  0x14   : > { %s549_s29 = scalar_lea.vmem %s577_s3, %s389_s24  ;;  %s221_s5 = sadd.s32 %s399_s4, %s595_s30 }
  0x15   : > { %265 = vst.msk [vmem:[%s549_s29] sm:$0x3] %vm264_vm0, %v484_v1  ;;  %s388_s6 = sshll.u32 %s221_s5, 2 }
  0x16   : > { %s223_s9 = scalar_lea.vmem %s574_s0, %s388_s6 }
  0x17   : > { %v238_v4 = vld [vmem:[%s223_s9] sm:$0xf]  ;;  %s390_s10 = scalar_select %p258_p12, 0, 1 }
  0x18   : > { %249 = vperm.xlu0 %443, %v246_v2  }
  0x19   : > { %v261_v7 = vstv %s390_s10 }
  0x1a   : > { %vm262_vm2 = vcmp.eq.s32.totalorder %v261_v7, 1 }
  0x82   : > { %v243_v3 = vpop.permute.xlu0 %242 }
  0x83   : > { %v245_v5 = vmul.f32 %v243_v3, %v238_v4 }
  0x8a   : > { %v250_v6 = vpop.permute.xlu0 %249 }
  0x8b   : > { %v252_v8 = vadd.f32 %v250_v6, %v245_v5 }
  0x8d   : > { %vm253_vm1 = vcmp.ge.f32.partialorder %v252_v8, 0.0  ;;  %v254_v9 = vmul.f32 0.2, %v252_v8 }
  0x8f   : > { %v255_v10 = vsel %vm253_vm1, %v252_v8, %v254_v9 }
  0x90   : > { %v263_v11 = vsel %vm262_vm2, %v255_v10, 0.0 }
  0x91   : > { %v266_v12 = vpack.c.bf16 %v263_v11, %v263_v11 }
  0x93   : > { %v268_v13 = vrot.slane %v266_v12, 2 }
  0x95   : > { %v272_v14 = vsel %vm269_vm3, %v266_v12, %v268_v13 }
  0x96   : > { %274 = vrot.lane.b32.xlu1 %v272_v14, %s485_s11 }
 0x108   : > { %v275_v15 = vpop.permute.xlu1 %274 }
 0x109   : > { %278 = vst.msk [vmem:[%s549_s29] sm:$0x3] %vm277_vm4, %v275_v15 }
 0x10a PF: > { %s13_s16 = sadd.s32 1, %s482_s16   ;;  %s578_s12 = smov %s474_s14 }
 0x10b   : > { %p10_p13 = scmp.ge.s32.totalorder %s13_s16, 28   ;;  %s579_s13 = smov %s478_s15 }
 0x10c   : > { %s580_s14 = smov %s583_s17  ;;  %s581_s15 = smov %s587_s18 }
 0x10d   :  { %12 = sbr.rel (!%p10_p13) target bundleno = 3 (0x3), region = 62 }

// kernel: _lambda_.3
= control target key start
LH: loop header
LB: loop body
LE: loop exit
PB: predicated region body
PF: predicated region fallthrough
CT: control target
= control target key end

     0   :  { %s1285_s15 = smov 0   ;;  %s1287_s16 = smov 0   ;;  %s1497_s0 = inlined_call_operand.vmem [shape: bf16[2,7,8,7], index: 0, kind: input, shape index: {}]   ;;  %s1498_s1 = inlined_call_operand.vmem [shape: bf16[36,4,8], index: 1, kind: input, shape index: {}]   ;;  %s1499_s2 = inlined_call_operand.vmem [shape: f32[4,1], index: 2, kind: input, shape index: {}]   ;;  %s1500_s3 = inlined_call_operand.vmem [shape: f32[2,10,4,10], index: 3, kind: output, shape index: {0}]   ;;  %s1501_s4 = inlined_call_operand.vmem [shape: f32[2,5,4,2], index: 4, kind: output, shape index: {1}]  }
   0x1   :  { %s1289_s17 = smov 0   ;;  %s1291_s18 = smov 0  }
   0x2   :  { %s1293_s19 = smov 0  }
   0x3 LB: > { %s24_s20 = sadd.s32 1, %s1246_s17  ;;  %s27_s21 = sadd.s32 1, %s1250_s18  ;;  %s1254_s19 = sphi %s1293_s19, %s15_s19   ;;  %s1250_s18 = sphi %s1291_s18, %s1505_s18   ;;  %s1246_s17 = sphi %s1289_s17, %s1504_s17   ;;  %s1242_s16 = sphi %s1287_s16, %s1503_s16   ;;  %s1238_s15 = sphi %s1285_s15, %s1502_s15  }
   0x4   : > { %p25_p0 = scmp.ge.s32.totalorder %s24_s20, 5  ;;  %p1094_p1 = scmp.ge.s32.totalorder %s1254_s19, 1 }
   0x5   : > { %p181_p2 = scmp.lt.s32.totalorder %s1254_s19, 11 }
   0x6   : > { %s1507_s20 = smov (%p25_p0, %s24_s20), 0  ;;  %s1509_s21 = smov (!%p25_p0, %s27_s21), %s1250_s18 }
   0x7   : > { %p182_p3 = pnand %p1094_p1, %p181_p2  ;;  %p29_p4 = scmp.ge.s32.totalorder %s1509_s21, 2 }
   0x8   : > { %p219_p5 = scmp.lt.s32.totalorder (!%p182_p3), %s1242_s16, 1  ;;  %s1099_s23 = sshll.u32 (!%p182_p3), %s1238_s15, 2 }
   0x9   : > { %s1511_s21 = smov (%p29_p4, %s1509_s21), 0  ;;  %185 = sbr.rel (%p182_p3) target bundleno = 504 (0x1f8), region = 32 }
   0xa   : > { %s1256_s6 = smov (!%p182_p3), 126   ;;  %s1257_s7 = smov (!%p182_p3), 127  }
   0xb   : > { %s1452_s25 = sshll.u32 (!%p182_p3), %s1238_s15, 1  ;;  %p236_p8 = scmp.lt.s32.totalorder (!%p182_p3), %s1238_s15, 4 }
   0xc   : > { %p227_p7 = scmp.lt.s32.totalorder (!%p182_p3), %s1452_s25, 9 }
   0xe   : > { %s1513_s16 = smov (!%p219_p5, %s1242_s16), 1  ;;  %vm266_vm0 = vcmask 1043456   ;;  %v254_v9 = vld [vmem:[%s1498_s1] sm:$0x3]  ;;  %vm262_vm1 = vcmask 64512   ;;  %v1258_v14 = vmov 0   ;;  %v780_v55 = vlaneseq }
   0xf   : > { %s1168_s22 = smul.u32 28, %s1513_s16  ;;  %v1107_v10 = vld [vmem:[%s1498_s1 + $0x6] sm:$0x3]  ;;  %v1111_v13 = vld [vmem:[%s1498_s1 + $0x12] sm:$0x3]  ;;  %1215 = vset.pattern.permute.xlu0 %v1258_v14  ;;  %v1259_v60 = vmov 0.0  }
  0x10   : > { %v351_v15 = vld [vmem:[%s1499_s2] sm:$0xf]  ;;  %v1115_v21 = vld [vmem:[%s1498_s1 + $0x16] sm:$0x3]  ;;  %v1109_v27 = vld [vmem:[%s1498_s1 + $0x8] sm:$0x3] }
  0x11   : > { %s223_s26 = scalar_lea.vmem %s1497_s0, %s1168_s22  ;;  %v1104_v20 = vld [vmem:[%s1498_s1 + $0x2] sm:$0x3]  ;;  %v1121_v28 = vld [vmem:[%s1498_s1 + $0x1c] sm:$0x3]  ;;  %v1112_v29 = vld [vmem:[%s1498_s1 + $0x14] sm:$0x3] }
  0x12   : > { %s244_s27 = scalar_lea.vmem %s223_s26, %s1099_s23  ;;  %v1124_v30 = vld [vmem:[%s1498_s1 + $0x26] sm:$0x3]  ;;  %v1117_v32 = vld [vmem:[%s1498_s1 + $0x18] sm:$0x3]  ;;  %v1129_v33 = vld [vmem:[%s1498_s1 + $0x2c] sm:$0x3] }
  0x13   : > { %v245_v0 = vld [vmem:[%s244_s27] sm:$0xf]  ;;  %v1103_v1 = vld [vmem:[%s244_s27 + $0x8] sm:$0xf]  ;;  %v1101_v3 = vld [vmem:[%s244_s27 + $0x4] sm:$0xf] }
  0x14   : > { %v258_v2 = vunpack.c.l.b16 %v245_v0  ;;  %v580_v4 = vunpack.c.l.b16 %v1103_v1  ;;  %v287_v5 = vsel %vm266_vm0, %v245_v0, 0  ;;  %v1326_v6 = vsel %vm266_vm0, %v1101_v3, 0  ;;  %v1119_v35 = vld [vmem:[%s1498_s1 + $0x1a] sm:$0x3]  ;;  %v1131_v36 = vld [vmem:[%s1498_s1 + $0x30] sm:$0x3] }
  0x15   : > { %296 = vmatpush.bf16.msra.mxu1 %v287_v5  ;;  %317 = vmatpush.bf16.msra.mxu2 %v1326_v6  ;;  %v327_v11 = vunpack.c.l.b16 %v1101_v3  ;;  %v561_v22 = vsel %vm266_vm0, %v1103_v1, 0  ;;  %v1123_v37 = vld [vmem:[%s1498_s1 + $0x24] sm:$0x3]  ;;  %v1135_v38 = vld [vmem:[%s1498_s1 + $0x36] sm:$0x3]  ;;  %v781_v56 = vshrl.u32 %v780_v55, 7 }
  0x16   : > { %v259_v7 = vpack.c.b16 %v258_v2, %v258_v2  ;;  %v581_v8 = vpack.c.b16 %v580_v4, %v580_v4  ;;  %v1127_v39 = vld [vmem:[%s1498_s1 + $0x2a] sm:$0x3]  ;;  %v1139_v40 = vld [vmem:[%s1498_s1 + $0x3a] sm:$0x3]  ;;  %v1133_v41 = vld [vmem:[%s1498_s1 + $0x32] sm:$0x3] }
  0x17   : > { %v328_v12 = vpack.c.b16 %v327_v11, %v327_v11  ;;  %v1145_v42 = vld [vmem:[%s1498_s1 + $0x40] sm:$0x3]  ;;  %v1136_v44 = vld [vmem:[%s1498_s1 + $0x38] sm:$0x3]  ;;  %v1147_v45 = vld [vmem:[%s1498_s1 + $0x42] sm:$0x3] }
  0x18   : > { %396 = vrot.lane.b32.xlu1 %v259_v7, %s1256_s6  ;;  %260 = vrot.lane.b32.xlu0 %v259_v7, %s1257_s7  ;;  %v1141_v47 = vld [vmem:[%s1498_s1 + $0x3c] sm:$0x3]  ;;  %v1143_v48 = vld [vmem:[%s1498_s1 + $0x3e] sm:$0x3]  ;;  %v783_v57 = vand.u32 127, %v780_v55  ;;  %v784_v58 = vmul.u32 2, %v781_v56 }
  0x19   : > { %388 = vmatpush.bf16.msrb.mxu1 %v287_v5  ;;  %582 = vrot.lane.b32.xlu2 %v581_v8, %s1257_s7  ;;  %v1149_v49 = vld [vmem:[%s1498_s1 + $0x44] sm:$0x3]  ;;  %v1151_v50 = vld [vmem:[%s1498_s1 + $0x46] sm:$0x3]  ;;  %vm796_vm3 = vcmask 1044480   ;;  %vm792_vm6 = vcmask 39936  }
  0x1a   : > { %1106 = vmatmul.msk.bf16.vlgmr.msra.gmra.mxu1 %vm262_vm1, %v254_v9  ;;  %1108 = vmatmul.msk.bf16.vlgmr.msra.gmra.mxu2 %vm262_vm1, %v1107_v10  ;;  %vm785_vm2 = vcmp.eq.s32.totalorder %v783_v57, %v784_v58  ;;  %v788_v0 = vadd.s32 1, %v784_v58  ;;  %vm901_vm5 = vcmp.lt.s32.totalorder %v783_v57, 5  ;;  %vm905_vm7 = vcmask 35840   ;;  %s897_s26 = sadd.s32 1, %s1452_s25  ;;  %s1169_s29 = smul.u32 10, %s1513_s16 }
  0x1b   : > { %v1153_v61 = vsel %vm785_vm2, 1.0, %v1259_v60  ;;  %p898_p6 = scmp.lt.s32.totalorder %s897_s26, 10  ;;  %s1515_s25 = smov (!%p227_p7, %s1452_s25), 9  ;;  %vm892_vm8 = vcmask 76800   ;;  %vm947_vm9 = vcmask 3072   ;;  %vm949_vm10 = vcmask 11272  }
  0x1c   : > { %vm789_vm4 = vcmp.eq.s32.totalorder %v783_v57, %v788_v0  ;;  %s230_s30 = sadd.s32 %s1169_s29, %s1515_s25  ;;  %s1170_s9 = smul.u32 5, %s1513_s16 }
  0x1d   : > { %v1154_v2 = vsel %vm789_vm4, 1.0, %v1259_v60  ;;  %s899_s27 = scalar_select %p898_p6, 1, 0 }
  0x1e   : > { %s1097_s5 = sshll.u32 %s230_s30, 2  ;;  %s1517_s15 = smov (!%p236_p8, %s1238_s15), 4 }
  0x1f   : > { %s900_s28 = scvt.s32.f32 %s899_s27  ;;  %s1470_s8 = scalar_lea.vmem %s1500_s3, %s1097_s5 }
  0x20   : > { %458 = vrot.lane.b32.xlu1 %v328_v12, %s1256_s6  ;;  %329 = vrot.lane.b32.xlu0 %v328_v12, %s1257_s7  ;;  %v1165_v12 = vsel %vm901_vm5, 1.0, %v1259_v60  ;;  %s239_s10 = sadd.s32 %s1170_s9, %s1517_s15 }
  0x21   : > { %757 = vrot.lane.b32.xlu2 %v581_v8, %s1256_s6  ;;  %s1098_s11 = sshll.u32 %s239_s10, 2 }
  0x22   : > { %s241_s14 = scalar_lea.vmem %s1501_s4, %s1098_s11 }
  0x28   : > { %354 = vperm.xlu0 %1215, %v351_v15  }
  0x2a   : > { %1114 = vmatmul.msk.bf16.vlgmr.msrb.gmra.mxu1 %vm262_vm1, %v1111_v13 }
  0x73   : > { %v583_v31 = vpop.permute.xlu2 %582 }
  0x74   : > { %v588_v34 = vsel %vm266_vm0, %v583_v31, 0 }
  0x7b   : > { %v758_v43 = vpop.permute.xlu2 %757 }
  0x7c   : > { %v763_v46 = vsel %vm266_vm0, %v758_v43, 0 }
  0x8a   : > { %v397_v16 = vpop.permute.xlu1 %396  ;;  %v261_v17 = vpop.permute.xlu0 %260 }
  0x8b   : > { %v268_v18 = vsel %vm266_vm0, %v261_v17, 0  ;;  %v402_v19 = vsel %vm266_vm0, %v397_v16, 0 }
  0x8c   : > { %277 = vmatpush.bf16.msra.mxu0 %v268_v18  ;;  %411 = vmatpush.bf16.msrb.mxu2 %v402_v19 }
  0x8f   : > { %1105 = vmatmul.msk.bf16.vlgmr.msra.gmra.mxu0 %vm262_vm1, %v1104_v20  ;;  %1116 = vmatmul.msk.bf16.vlgmr.msrb.gmra.mxu2 %vm262_vm1, %v1115_v21 }
  0x90   : > { %372 = vmatpush.bf16.msrb.mxu0 %v268_v18  ;;  %495 = vmatpush.bf16.msra.mxu2 %v268_v18 }
  0x92   : > { %v459_v23 = vpop.permute.xlu1 %458  ;;  %v330_v24 = vpop.permute.xlu0 %329 }
  0x93   : > { %v464_v25 = vsel %vm266_vm0, %v459_v23, 0  ;;  %v335_v26 = vsel %vm266_vm0, %v330_v24, 0 }
  0x94   : > { %570 = vmatpush.bf16.msrb.mxu2 %v561_v22  ;;  %344 = vmatpush.bf16.msra.mxu3 %v335_v26 }
  0x95   : > { %449 = vmatpush.bf16.msra.mxu0 %v335_v26  ;;  %473 = vmatpush.bf16.msra.mxu1 %v464_v25 }
  0x97   : > { %1110 = vmatmul.msk.bf16.vlgmr.msra.gmra.mxu3 %vm262_vm1, %v1109_v27  ;;  %v298_v51 = vpop.f32.mrf.mxu1 }
  0x98   : > { %430 = vmatpush.bf16.msrb.mxu3 %v1326_v6  ;;  %1122 = vmatmul.msk.bf16.vlgmr.msra.gmra.mxu1 %vm262_vm1, %v1121_v28 }
  0x99   : > { %548 = vmatpush.bf16.msrb.mxu1 %v335_v26 }
  0x9a   : > { %v1442_v7 = vpop.permute.xlu0 %354 }
  0x9c   : > { %511 = vmatpush.bf16.msra.mxu3 %v287_v5 }
  0x9d   : > { %635 = vmatpush.bf16.msra.mxu1 %v287_v5  ;;  %v319_v52 = vpop.f32.mrf.mxu2 }
  0x9f   : > { %1113 = vmatmul.msk.bf16.vlgmr.msrb.gmra.mxu0 %vm262_vm1, %v1112_v29  ;;  %1125 = vmatmul.msk.bf16.vlgmr.msra.gmra.mxu2 %vm262_vm1, %v1124_v30  ;;  %v300_v53 = vpop.f32.mrf.mxu1 }
  0xa0   : > { %653 = vmatpush.bf16.msra.mxu2 %v402_v19  ;;  %529 = vmatpush.bf16.msrb.mxu0 %v1326_v6 }
  0xa5   : > { %v321_v54 = vpop.f32.mrf.mxu2 }
  0xa7   : > { %1118 = vmatmul.msk.bf16.vlgmr.msrb.gmra.mxu3 %vm262_vm1, %v1117_v32  ;;  %v390_v59 = vpop.f32.mrf.mxu1 }
  0xa8   : > { %1130 = vmatmul.msk.bf16.vlgmr.msrb.gmra.mxu1 %vm262_vm1, %v1129_v33  ;;  %597 = vmatpush.bf16.msrb.mxu3 %v588_v34 }
  0xa9   : > { %710 = vmatpush.bf16.msrb.mxu1 %v464_v25 }
  0xaf   : > { %1120 = vmatmul.msk.bf16.vlgmr.msra.gmra.mxu0 %vm262_vm1, %v1119_v35  ;;  %1132 = vmatmul.msk.bf16.vlgmr.msrb.gmra.mxu2 %vm262_vm1, %v1131_v36  ;;  %v392_v62 = vpop.f32.mrf.mxu1 }
  0xb0   : > { %619 = vmatpush.bf16.msra.mxu0 %v268_v18  ;;  %729 = vmatpush.bf16.msrb.mxu2 %v561_v22 }
  0xb7   : > { %1126 = vmatmul.msk.bf16.vlgmr.msra.gmra.mxu3 %vm262_vm1, %v1123_v37 }
  0xb8   : > { %672 = vmatpush.bf16.msra.mxu3 %v1326_v6  ;;  %1138 = vmatmul.msk.bf16.vlgmr.msra.gmra.mxu1 %vm262_vm1, %v1135_v38 }
  0xb9   : > { %1155 = vmatpush.msk.msra.mxu1 %vm796_vm3, %v1154_v2 }
  0xbf   : > { %1128 = vmatmul.msk.bf16.vlgmr.msrb.gmra.mxu0 %vm262_vm1, %v1127_v39  ;;  %1140 = vmatmul.msk.bf16.vlgmr.msra.gmra.mxu2 %vm262_vm1, %v1139_v40 }
  0xc0   : > { %691 = vmatpush.bf16.msrb.mxu0 %v335_v26  ;;  %1157 = vmatpush.msk.msra.mxu2 %vm796_vm3, %v1153_v61 }
  0xc7   : > { %1134 = vmatmul.msk.bf16.vlgmr.msrb.gmra.mxu3 %vm262_vm1, %v1133_v41 }
  0xc8   : > { %748 = vmatpush.bf16.msrb.mxu3 %v588_v34  ;;  %1146 = vmatmul.msk.bf16.vlgmr.msrb.gmra.mxu1 %vm262_vm1, %v1145_v42 }
  0xc9   : > { %1161 = vmatpush.msk.msrb.mxu1 %vm796_vm3, %v1153_v61 }
  0xcf   : > { %1137 = vmatmul.msk.bf16.vlgmr.msra.gmra.mxu0 %vm262_vm1, %v1136_v44  ;;  %1148 = vmatmul.msk.bf16.vlgmr.msrb.gmra.mxu2 %vm262_vm1, %v1147_v45 }
  0xd0   : > { %772 = vmatpush.bf16.msra.mxu0 %v763_v46 }
  0xd7   : > { %1142 = vmatmul.msk.bf16.vlgmr.msra.gmra.mxu3 %vm262_vm1, %v1141_v47 }
  0xd8   : > { %1159 = vmatpush.msk.msra.mxu3 %vm796_vm3, %v1154_v2 }
  0xdf   : > { %1144 = vmatmul.msk.bf16.vlgmr.msrb.gmra.mxu0 %vm262_vm1, %v1143_v48 }
  0xe7   : > { %1150 = vmatmul.msk.bf16.vlgmr.msrb.gmra.mxu3 %vm262_vm1, %v1149_v49 }
  0xef   : > { %1152 = vmatmul.msk.bf16.vlgmr.msra.gmra.mxu0 %vm262_vm1, %v1151_v50 }
 0x10c   : > { %v279_v63 = vpop.f32.mrf.mxu0 }
 0x10d   : > { %v299_v4 = vadd.f32 %v298_v51, %v279_v63 }
 0x10f   : > { %v323_v6 = vadd.f32 %v319_v52, %v299_v4  ;;  %v925_v52 = vstv %s900_s28 }
 0x110   : > { %v926_v57 = vmul.f32 %v1165_v12, %v925_v52 }
 0x112   : > { %v413_v1 = vpop.f32.mrf.mxu2 }
 0x114   : > { %v281_v3 = vpop.f32.mrf.mxu0 }
 0x115   : > { %v475_v5 = vpop.f32.mrf.mxu1 }
 0x11a   : > { %v346_v8 = vpop.f32.mrf.mxu3  ;;  %v415_v9 = vpop.f32.mrf.mxu2 }
 0x11b   : > { %v350_v10 = vadd.f32 %v346_v8, %v323_v6 }
 0x11c   : > { %v374_v11 = vpop.f32.mrf.mxu0 }
 0x11d   : > { %v357_v13 = vadd.f32 %v1442_v7, %v350_v10  ;;  %v477_v14 = vpop.f32.mrf.mxu1  ;;  %v391_v22 = vadd.f32 %v390_v59, %v374_v11 }
 0x11f   : > { %1158 = vmatmul.msk.f32.vlgmr.msra.gmra.mxu2 %vm792_vm6, %v357_v13  ;;  %v904_v15 = vmul.f32 %v1165_v12, %v357_v13  ;;  %v417_v24 = vadd.f32 %v413_v1, %v391_v22 }
 0x121   : > { %v906_v16 = vsel %vm905_vm7, %v904_v15, 0.0  ;;  %v910_v17 = vmul.f32 %v904_v15, %v904_v15 }
 0x122   : > { %v348_v18 = vpop.f32.mrf.mxu3  ;;  %907 = vadd.xlane.f32.xlu1 %v906_v16  ;;  %v497_v19 = vpop.f32.mrf.mxu2 }
 0x123   : > { %v911_v20 = vsel %vm905_vm7, %v910_v17, 0.0 }
 0x124   : > { %v376_v21 = vpop.f32.mrf.mxu0  ;;  %912 = vadd.xlane.f32.xlu0 %v911_v20 }
 0x125   : > { %v550_v23 = vpop.f32.mrf.mxu1 }
 0x12a   : > { %v432_v25 = vpop.f32.mrf.mxu3  ;;  %v499_v26 = vpop.f32.mrf.mxu2 }
 0x12b   : > { %v436_v27 = vadd.f32 %v432_v25, %v417_v24 }
 0x12c   : > { %v451_v28 = vpop.f32.mrf.mxu0 }
 0x12d   : > { %v455_v29 = vadd.f32 %v451_v28, %v436_v27  ;;  %v552_v30 = vpop.f32.mrf.mxu1 }
 0x12f   : > { %v479_v31 = vadd.f32 %v475_v5, %v455_v29 }
 0x131   : > { %v480_v32 = vadd.f32 %v479_v31, %v1442_v7 }
 0x132   : > { %v434_v33 = vpop.f32.mrf.mxu3  ;;  %v572_v34 = vpop.f32.mrf.mxu2 }
 0x133   : > { %1156 = vmatmul.msk.f32.vlgmr.msra.gmra.mxu1 %vm792_vm6, %v480_v32  ;;  %v915_v35 = vmul.f32 %v1165_v12, %v480_v32 }
 0x134   : > { %v453_v36 = vpop.f32.mrf.mxu0 }
 0x135   : > { %v916_v37 = vsel %vm905_vm7, %v915_v35, 0.0  ;;  %v637_v38 = vpop.f32.mrf.mxu1  ;;  %v920_v39 = vmul.f32 %v915_v35, %v915_v35 }
 0x136   : > { %917 = vadd.xlane.f32.xlu2 %v916_v37 }
 0x137   : > { %v921_v44 = vsel %vm905_vm7, %v920_v39, 0.0 }
 0x13a   : > { %v513_v40 = vpop.f32.mrf.mxu3  ;;  %v574_v41 = vpop.f32.mrf.mxu2 }
 0x13b   : > { %v514_v43 = vadd.f32 %v513_v40, %v497_v19 }
 0x13c   : > { %v531_v42 = vpop.f32.mrf.mxu0 }
 0x13d   : > { %v639_v45 = vpop.f32.mrf.mxu1  ;;  %v535_v46 = vadd.f32 %v531_v42, %v514_v43 }
 0x13e   : > { %922 = vadd.xlane.f32.xlu2 %v921_v44 }
 0x13f   : > { %v554_v50 = vadd.f32 %v550_v23, %v535_v46 }
 0x141   : > { %v576_v53 = vadd.f32 %v572_v34, %v554_v50 }
 0x142   : > { %v515_v47 = vpop.f32.mrf.mxu3  ;;  %v655_v48 = vpop.f32.mrf.mxu2 }
 0x144   : > { %v533_v49 = vpop.f32.mrf.mxu0 }
 0x145   : > { %v712_v51 = vpop.f32.mrf.mxu1 }
 0x14a   : > { %v599_v54 = vpop.f32.mrf.mxu3  ;;  %v657_v55 = vpop.f32.mrf.mxu2 }
 0x14b   : > { %v603_v56 = vadd.f32 %v599_v54, %v576_v53 }
 0x14c   : > { %v621_v58 = vpop.f32.mrf.mxu0 }
 0x14d   : > { %v604_v59 = vadd.f32 %v603_v56, %v1442_v7  ;;  %v714_v60 = vpop.f32.mrf.mxu1  ;;  %v638_v4 = vadd.f32 %v637_v38, %v621_v58 }
 0x14f   : > { %1162 = vmatmul.msk.f32.vlgmr.msrb.gmra.mxu1 %vm792_vm6, %v604_v59  ;;  %v927_v61 = vmul.f32 %v926_v57, %v604_v59  ;;  %v659_v8 = vadd.f32 %v655_v48, %v638_v4 }
 0x151   : > { %v928_v62 = vsel %vm905_vm7, %v927_v61, 0.0  ;;  %v932_v63 = vmul.f32 %v927_v61, %v927_v61 }
 0x152   : > { %v601_v0 = vpop.f32.mrf.mxu3  ;;  %929 = vadd.xlane.f32.xlu1 %v928_v62  ;;  %v731_v1 = vpop.f32.mrf.mxu2 }
 0x153   : > { %v933_v2 = vsel %vm905_vm7, %v932_v63, 0.0 }
 0x154   : > { %v623_v3 = vpop.f32.mrf.mxu0  ;;  %934 = vadd.xlane.f32.xlu2 %v933_v2 }
 0x15a   : > { %v674_v5 = vpop.f32.mrf.mxu3  ;;  %v733_v6 = vpop.f32.mrf.mxu2 }
 0x15b   : > { %v678_v10 = vadd.f32 %v674_v5, %v659_v8 }
 0x15c   : > { %v693_v9 = vpop.f32.mrf.mxu0 }
 0x15d   : > { %v697_v11 = vadd.f32 %v693_v9, %v678_v10 }
 0x15f   : > { %v716_v14 = vadd.f32 %v712_v51, %v697_v11 }
 0x161   : > { %v735_v15 = vadd.f32 %v731_v1, %v716_v14 }
 0x162   : > { %v676_v12 = vpop.f32.mrf.mxu3 }
 0x164   : > { %v695_v13 = vpop.f32.mrf.mxu0 }
 0x16a   : > { %v750_v16 = vpop.f32.mrf.mxu3 }
 0x16b   : > { %v754_v17 = vadd.f32 %v750_v16, %v735_v15 }
 0x16c   : > { %v774_v18 = vpop.f32.mrf.mxu0 }
 0x16d   : > { %v778_v19 = vadd.f32 %v774_v18, %v754_v17 }
 0x16f   : > { %v779_v20 = vadd.f32 %v778_v19, %v1442_v7 }
 0x171   : > { %1160 = vmatmul.msk.f32.vlgmr.msra.gmra.mxu3 %vm792_vm6, %v779_v20  ;;  %v937_v21 = vmul.f32 %v926_v57, %v779_v20 }
 0x172   : > { %v752_v22 = vpop.f32.mrf.mxu3 }
 0x173   : > { %v938_v23 = vsel %vm905_vm7, %v937_v21, 0.0  ;;  %v942_v24 = vmul.f32 %v937_v21, %v937_v21 }
 0x174   : > { %v776_v25 = vpop.f32.mrf.mxu0  ;;  %939 = vadd.xlane.f32.xlu1 %v938_v23 }
 0x175   : > { %v943_v26 = vsel %vm905_vm7, %v942_v24, 0.0 }
 0x176   : > { %944 = vadd.xlane.f32.xlu2 %v943_v26 }
 0x195   : > { %v908_v30 = vpop.xlane.xlu1 %907 }
 0x197   : > { %v913_v35 = vpop.xlane.xlu0 %912 }
 0x1a2   : > { %v843_v7 = vpop.f32.mrf.mxu2 }
 0x1a9   : > { %v918_v29 = vpop.xlane.xlu2 %917 }
 0x1aa   : > { %v919_v34 = vadd.f32 %v918_v29, %v908_v30 }
 0x1b0   : > { %v817_v27 = vpop.f32.mrf.mxu1 }
 0x1b1   : > { %v844_v28 = vadd.f32 %v843_v7, %v817_v27  ;;  %v923_v31 = vpop.xlane.xlu2 %922 }
 0x1b2   : > { %v924_v36 = vadd.f32 %v923_v31, %v913_v35 }
 0x1b3   : > { %893 = vst.msk [vmem:[%s1470_s8] sm:$0xf] %vm892_vm8, %v844_v28 }
 0x1c5   : > { %v930_v32 = vpop.xlane.xlu1 %929 }
 0x1c6   : > { %v931_v37 = vadd.f32 %v930_v32, %v919_v34 }
 0x1c7   : > { %v935_v33 = vpop.xlane.xlu2 %934 }
 0x1c8   : > { %v936_v39 = vadd.f32 %v935_v33, %v924_v36 }
 0x1cc   : > { %v889_v43 = vpop.f32.mrf.mxu1 }
 0x1e7   : > { %v940_v38 = vpop.xlane.xlu1 %939 }
 0x1e8   : > { %v941_v40 = vadd.f32 %v940_v38, %v931_v37 }
 0x1e9   : > { %v945_v41 = vpop.xlane.xlu2 %944 }
 0x1ea   : > { %948 = vst.msk [vmem:[%s241_s14] sm:$0xf] %vm947_vm9, %v941_v40  ;;  %v946_v42 = vadd.f32 %v945_v41, %v936_v39 }
 0x1ec   : > { %950 = vst.msk [vmem:[%s241_s14] sm:$0xf] %vm949_vm10, %v946_v42 }
 0x1f4   : > { %v866_v44 = vpop.f32.mrf.mxu3 }
 0x1f5   : > { %v890_v45 = vadd.f32 %v889_v43, %v866_v44 }
 0x1f7   : > { %1163 = vst.msk [vmem:[%s1470_s8 + $0x4] sm:$0xf] %vm892_vm8, %v890_v45 }
 0x1f8 PF: > { %s15_s19 = sadd.s32 1, %s1254_s19   ;;  %s1502_s15 = smov %s1246_s17 }
 0x1f9   : > { %p12_p9 = scmp.ge.s32.totalorder %s15_s19, 12   ;;  %s1503_s16 = smov %s1250_s18 }
 0x1fa   : > { %s1504_s17 = smov %s1507_s20  ;;  %s1505_s18 = smov %s1511_s21 }
 0x1fb   :  { %14 = sbr.rel (!%p12_p9) target bundleno = 3 (0x3), region = 102 }

// kernel: _lambda_.5
= control target key start
LH: loop header
LB: loop body
LE: loop exit
PB: predicated region body
PF: predicated region fallthrough
CT: control target
= control target key end

     0   :  { %s1230_s12 = smov 0   ;;  %s1232_s13 = smov 0   ;;  %s1466_s0 = inlined_call_operand.vmem [shape: bf16[2,13,4,13], index: 0, kind: input, shape index: {}]   ;;  %s1467_s1 = inlined_call_operand.vmem [shape: bf16[36,3,4], index: 1, kind: input, shape index: {}]   ;;  %s1468_s2 = inlined_call_operand.vmem [shape: f32[3,1], index: 2, kind: input, shape index: {}]   ;;  %s1469_s3 = inlined_call_operand.vmem [shape: f32[2,22,3,22], index: 3, kind: output, shape index: {}]  }
   0x1   :  { %s1234_s14 = smov 0   ;;  %s1236_s15 = smov 0  }
   0x2   :  { %s1238_s16 = smov 0  }
   0x3 LB: > { %s22_s17 = sadd.s32 1, %s1195_s14  ;;  %s25_s18 = sadd.s32 1, %s1199_s15  ;;  %s1203_s16 = sphi %s1238_s16, %s13_s16   ;;  %s1199_s15 = sphi %s1236_s15, %s1475_s15   ;;  %s1195_s14 = sphi %s1234_s14, %s1474_s14   ;;  %s1191_s13 = sphi %s1232_s13, %s1473_s13   ;;  %s1187_s12 = sphi %s1230_s12, %s1472_s12  }
   0x4   : > { %p23_p0 = scmp.ge.s32.totalorder %s22_s17, 11  ;;  %p1036_p1 = scmp.ge.s32.totalorder %s1203_s16, 1 }
   0x5   : > { %p151_p2 = scmp.lt.s32.totalorder %s1203_s16, 23 }
   0x6   : > { %s1477_s17 = smov (%p23_p0, %s22_s17), 0  ;;  %s1479_s18 = smov (!%p23_p0, %s25_s18), %s1199_s15 }
   0x7   : > { %p152_p3 = pnand %p1036_p1, %p151_p2  ;;  %p27_p4 = scmp.ge.s32.totalorder %s1479_s18, 2 }
   0x8   : > { %p179_p5 = scmp.lt.s32.totalorder (!%p152_p3), %s1191_s13, 1  ;;  %s1263_s20 = sshll.u32 (!%p152_p3), %s1187_s12, 1 }
   0x9   : > { %s1481_s18 = smov (%p27_p4, %s1479_s18), 0  ;;  %155 = sbr.rel (%p152_p3) target bundleno = 531 (0x213), region = 32 }
   0xa   : > { %s1205_s25 = smov (!%p152_p3), 127   ;;  %s1206_s26 = smov (!%p152_p3), 126  }
   0xb   : > { %p187_p6 = scmp.lt.s32.totalorder (!%p152_p3), %s1263_s20, 21 }
   0xe   : > { %s1483_s13 = smov (!%p179_p5, %s1191_s13), 1  ;;  %vm219_vm0 = vcmask 1041408   ;;  %vm215_vm1 = vcmask 31744   ;;  %v206_v16 = vld [vmem:[%s1467_s1] sm:$0x3]  ;;  %v1207_v26 = vmov 0  }
   0xf   : > { %s1113_s19 = smul.u32 26, %s1483_s13  ;;  %v1048_v18 = vld [vmem:[%s1467_s1 + $0x6] sm:$0x3]  ;;  %v1052_v21 = vld [vmem:[%s1467_s1 + $0x12] sm:$0x3]  ;;  %1160 = vset.pattern.permute.xlu0 %v1207_v26  ;;  %vm838_vm3 = vcmask 1042432  }
  0x10   : > { %v1045_v25 = vld [vmem:[%s1467_s1 + $0x2] sm:$0x3]  ;;  %v1050_v30 = vld [vmem:[%s1467_s1 + $0x8] sm:$0x3]  ;;  %v1053_v35 = vld [vmem:[%s1467_s1 + $0x14] sm:$0x3] }
  0x11   : > { %s183_s23 = scalar_lea.vmem %s1466_s0, %s1113_s19  ;;  %v303_v27 = vld [vmem:[%s1468_s2] sm:$0x7]  ;;  %v1056_v40 = vld [vmem:[%s1467_s1 + $0x16] sm:$0x3]  ;;  %v1058_v41 = vld [vmem:[%s1467_s1 + $0x18] sm:$0x3] }
  0x12   : > { %s196_s24 = scalar_lea.vmem %s183_s23, %s1263_s20  ;;  %v1060_v43 = vld [vmem:[%s1467_s1 + $0x1a] sm:$0x3]  ;;  %v1062_v48 = vld [vmem:[%s1467_s1 + $0x1c] sm:$0x3]  ;;  %v1065_v49 = vld [vmem:[%s1467_s1 + $0x26] sm:$0x3] }
  0x13   : > { %v197_v0 = vld [vmem:[%s196_s24] sm:$0x3]  ;;  %v1042_v1 = vld [vmem:[%s196_s24 + $0x2] sm:$0x3]  ;;  %v1276_v9 = vld [vmem:[%s196_s24 + $0x4] sm:$0x3] }
  0x14   : > { %210 = vst [vmem:[#allocation1] ss:$4 sm:$0xff] %v197_v0  ;;  %v1284_v14 = vsel %vm219_vm0, %v197_v0, 0  ;;  %v1292_v17 = vsel %vm219_vm0, %v1042_v1, 0  ;;  %v551_v42 = vsel %vm219_vm0, %v1276_v9, 0  ;;  %vm834_vm7 = vcmask 89088  }
  0x15   : > { %248 = vmatpush.bf16.msra.mxu1 %v1284_v14  ;;  %269 = vmatpush.bf16.msra.mxu2 %v1292_v17  ;;  %v1064_v50 = vld [vmem:[%s1467_s1 + $0x24] sm:$0x3]  ;;  %v1068_v51 = vld [vmem:[%s1467_s1 + $0x2a] sm:$0x3]  ;;  %v1072_v52 = vld [vmem:[%s1467_s1 + $0x30] sm:$0x3] }
  0x16   : > { %v1070_v53 = vld [vmem:[%s1467_s1 + $0x2c] sm:$0x3]  ;;  %v1074_v56 = vld [vmem:[%s1467_s1 + $0x32] sm:$0x3]  ;;  %v1077_v61 = vld [vmem:[%s1467_s1 + $0x38] sm:$0x3] }
  0x17   : > { %v1076_v62 = vld [vmem:[%s1467_s1 + $0x36] sm:$0x3]  ;;  %s1114_s12 = smul.u32 22, %s1483_s13  ;;  %s1485_s20 = smov (!%p187_p6, %s1263_s20), 21  ;;  %vm936_vm8 = vcmask 174080  }
  0x18   : > { %1047 = vmatmul.msk.bf16.vlgmr.msra.gmra.mxu1 %vm215_vm1, %v206_v16  ;;  %1049 = vmatmul.msk.bf16.vlgmr.msra.gmra.mxu2 %vm215_vm1, %v1048_v18 }
  0x19   : > { %348 = vmatpush.bf16.msrb.mxu1 %v1284_v14  ;;  %s190_s19 = sadd.s32 %s1114_s12, %s1485_s20 }
  0x1a   : > { %s1039_s21 = sshll.u32 %s190_s19, 2 }
  0x1b   : > { %v211_v2 = vld.sshfl [vmem:[#allocation1] sm:$0xff pattern:$0x73625140]  ;;  %s192_s24 = scalar_lea.vmem %s1469_s3, %s1039_s21 }
  0x1c   : > { %213 = vrot.lane.b32.xlu0 %v211_v2, %s1205_s25  ;;  %278 = vst [vmem:[#allocation1] ss:$4 sm:$0xff] %v1042_v1  ;;  %v1082_v2 = vld [vmem:[%s1467_s1 + $0x3c] sm:$0x3] }
  0x23   : > { %v279_v3 = vld.sshfl [vmem:[#allocation1] sm:$0xff pattern:$0x73625140] }
  0x24   : > { %281 = vrot.lane.b32.xlu0 %v279_v3, %s1205_s25  ;;  %314 = vst [vmem:[#allocation1] ss:$4 sm:$0xff] %v197_v0 }
  0x28   : > { %1055 = vmatmul.msk.bf16.vlgmr.msrb.gmra.mxu1 %vm215_vm1, %v1052_v21 }
  0x2b   : > { %v315_v4 = vld.sshfl [vmem:[#allocation1] sm:$0xff pattern:$0x73625140] }
  0x2c   : > { %317 = vrot.lane.b32.xlu1 %v315_v4, %s1205_s25  ;;  %356 = vst [vmem:[#allocation1] ss:$4 sm:$0xff] %v197_v0 }
  0x33   : > { %v357_v5 = vld.sshfl [vmem:[#allocation1] sm:$0xff pattern:$0x73625140] }
  0x34   : > { %359 = vrot.lane.b32.xlu1 %v357_v5, %s1206_s26  ;;  %402 = vst [vmem:[#allocation1] ss:$4 sm:$0xff] %v1042_v1  ;;  %v1084_v5 = vld [vmem:[%s1467_s1 + $0x3e] sm:$0x3] }
  0x3b   : > { %v403_v6 = vld.sshfl [vmem:[#allocation1] sm:$0xff pattern:$0x73625140] }
  0x3c   : > { %429 = vst [vmem:[#allocation1] ss:$4 sm:$0xff] %v1042_v1  ;;  %405 = vrot.lane.b32.xlu2 %v403_v6, %s1205_s25 }
  0x43   : > { %v430_v7 = vld.sshfl [vmem:[#allocation1] sm:$0xff pattern:$0x73625140] }
  0x44   : > { %432 = vrot.lane.b32.xlu0 %v430_v7, %s1206_s26  ;;  %459 = vst [vmem:[#allocation1] ss:$4 sm:$0xff] %v197_v0 }
  0x4b   : > { %v460_v8 = vld.sshfl [vmem:[#allocation1] sm:$0xff pattern:$0x73625140] }
  0x4c   : > { %520 = vst [vmem:[#allocation1] ss:$4 sm:$0xff] %v1042_v1  ;;  %462 = vrot.lane.b32.xlu2 %v460_v8, %s1205_s25  ;;  %v1088_v8 = vld [vmem:[%s1467_s1 + $0x42] sm:$0x3] }
  0x53   : > { %v521_v10 = vld.sshfl [vmem:[#allocation1] sm:$0xff pattern:$0x73625140] }
  0x54   : > { %569 = vst [vmem:[#allocation1] ss:$4 sm:$0xff] %v1276_v9  ;;  %523 = vrot.lane.b32.xlu2 %v521_v10, %s1205_s25 }
  0x5b   : > { %v570_v11 = vld.sshfl [vmem:[#allocation1] sm:$0xff pattern:$0x73625140] }
  0x5c   : > { %572 = vrot.lane.b32.xlu1 %v570_v11, %s1205_s25  ;;  %599 = vst [vmem:[#allocation1] ss:$4 sm:$0xff] %v197_v0 }
  0x63   : > { %v600_v12 = vld.sshfl [vmem:[#allocation1] sm:$0xff pattern:$0x73625140] }
  0x64   : > { %602 = vrot.lane.b32.xlu0 %v600_v12, %s1205_s25  ;;  %641 = vst [vmem:[#allocation1] ss:$4 sm:$0xff] %v197_v0 }
  0x6b   : > { %v642_v13 = vld.sshfl [vmem:[#allocation1] sm:$0xff pattern:$0x73625140] }
  0x6c   : > { %644 = vrot.lane.b32.xlu1 %v642_v13, %s1206_s26  ;;  %687 = vst [vmem:[#allocation1] ss:$4 sm:$0xff] %v1042_v1  ;;  %v1090_v13 = vld [vmem:[%s1467_s1 + $0x44] sm:$0x3] }
  0x73   : > { %v688_v15 = vld.sshfl [vmem:[#allocation1] sm:$0xff pattern:$0x73625140] }
  0x74   : > { %714 = vst [vmem:[#allocation1] ss:$4 sm:$0xff] %v1042_v1  ;;  %690 = vrot.lane.b32.xlu2 %v688_v15, %s1205_s25  ;;  %v1080_v1 = vld [vmem:[%s1467_s1 + $0x3a] sm:$0x3] }
  0x7b   : > { %v715_v19 = vld.sshfl [vmem:[#allocation1] sm:$0xff pattern:$0x73625140] }
  0x7c   : > { %717 = vrot.lane.b32.xlu1 %v715_v19, %s1206_s26  ;;  %760 = vst [vmem:[#allocation1] ss:$4 sm:$0xff] %v1276_v9 }
  0x83   : > { %v761_v20 = vld.sshfl [vmem:[#allocation1] sm:$0xff pattern:$0x73625140] }
  0x84   : > { %763 = vrot.lane.b32.xlu0 %v761_v20, %s1205_s25  ;;  %787 = vst [vmem:[#allocation1] ss:$4 sm:$0xff] %v1276_v9  ;;  %v1086_v9 = vld [vmem:[%s1467_s1 + $0x40] sm:$0x3] }
  0x8b   : > { %v788_v22 = vld.sshfl [vmem:[#allocation1] sm:$0xff pattern:$0x73625140] }
  0x8c   : > { %790 = vrot.lane.b32.xlu2 %v788_v22, %s1206_s26  ;;  %306 = vperm.xlu0 %1160, %v303_v27  }
  0x8e   : > { %v214_v23 = vpop.permute.xlu0 %213 }
  0x8f   : > { %v221_v24 = vsel %vm219_vm0, %v214_v23, 0 }
  0x90   : > { %230 = vmatpush.bf16.msra.mxu0 %v221_v24  ;;  %v1208_v24 = vmov 0.0  }
  0x93   : > { %1046 = vmatmul.msk.bf16.vlgmr.msra.gmra.mxu0 %vm215_vm1, %v1045_v25 }
  0x95   : > { %v250_v10 = vpop.f32.mrf.mxu1 }
  0x96   : > { %v282_v28 = vpop.permute.xlu0 %281  ;;  %v406_v31 = vpop.permute.xlu2 %405 }
  0x97   : > { %v287_v29 = vsel %vm219_vm0, %v282_v28, 0  ;;  %v411_v33 = vsel %vm219_vm0, %v406_v31, 0  ;;  %v1209_v28 = vmov 1.0  }
  0x98   : > { %296 = vmatpush.bf16.msra.mxu3 %v287_v29 }
  0x9b   : > { %1051 = vmatmul.msk.bf16.vlgmr.msra.gmra.mxu3 %vm215_vm1, %v1050_v30  ;;  %v271_v16 = vpop.f32.mrf.mxu2 }
  0x9c   : > { %393 = vmatpush.bf16.msrb.mxu3 %v1292_v17 }
  0x9d   : > { %v252_v15 = vpop.f32.mrf.mxu1 }
  0x9e   : > { %v318_v32 = vpop.permute.xlu1 %317 }
  0x9f   : > { %v323_v34 = vsel %vm219_vm0, %v318_v32, 0 }
  0xa0   : > { %493 = vmatpush.bf16.msra.mxu3 %v1284_v14  ;;  %332 = vmatpush.bf16.msrb.mxu0 %v323_v34 }
  0xa3   : > { %1054 = vmatmul.msk.bf16.vlgmr.msrb.gmra.mxu0 %vm215_vm1, %v1053_v35  ;;  %v273_v23 = vpop.f32.mrf.mxu2 }
  0xa4   : > { %420 = vmatpush.bf16.msra.mxu0 %v411_v33 }
  0xa5   : > { %v350_v22 = vpop.f32.mrf.mxu1 }
  0xa6   : > { %v360_v36 = vpop.permute.xlu1 %359  ;;  %v463_v37 = vpop.permute.xlu2 %462 }
  0xa7   : > { %v365_v38 = vsel %vm219_vm0, %v360_v36, 0  ;;  %v468_v39 = vsel %vm219_vm0, %v463_v37, 0 }
  0xa8   : > { %511 = vmatpush.bf16.msrb.mxu0 %v1292_v17  ;;  %374 = vmatpush.bf16.msrb.mxu2 %v365_v38 }
  0xab   : > { %1057 = vmatmul.msk.bf16.vlgmr.msrb.gmra.mxu2 %vm215_vm1, %v1056_v40  ;;  %1059 = vmatmul.msk.bf16.vlgmr.msrb.gmra.mxu3 %vm215_vm1, %v1058_v41 }
  0xac   : > { %477 = vmatpush.bf16.msra.mxu2 %v468_v39 }
  0xad   : > { %v352_v29 = vpop.f32.mrf.mxu1 }
  0xae   : > { %v524_v44 = vpop.permute.xlu2 %523 }
  0xaf   : > { %v529_v46 = vsel %vm219_vm0, %v524_v44, 0 }
  0xb0   : > { %560 = vmatpush.bf16.msrb.mxu2 %v551_v42 }
  0xb3   : > { %1061 = vmatmul.msk.bf16.vlgmr.msra.gmra.mxu0 %vm215_vm1, %v1060_v43 }
  0xb6   : > { %v433_v45 = vpop.permute.xlu0 %432 }
  0xb7   : > { %v438_v47 = vsel %vm219_vm0, %v433_v45, 0 }
  0xb8   : > { %447 = vmatpush.bf16.msra.mxu1 %v438_v47 }
  0xbb   : > { %1063 = vmatmul.msk.bf16.vlgmr.msra.gmra.mxu1 %vm215_vm1, %v1062_v48  ;;  %1066 = vmatmul.msk.bf16.vlgmr.msra.gmra.mxu2 %vm215_vm1, %v1065_v49 }
  0xbc   : > { %538 = vmatpush.bf16.msrb.mxu1 %v529_v46  ;;  %1067 = vmatmul.msk.bf16.vlgmr.msra.gmra.mxu3 %vm215_vm1, %v1064_v50 }
  0xc0   : > { %633 = vmatpush.bf16.msra.mxu1 %v1284_v14  ;;  %v1092_v14 = vld [vmem:[%s1467_s1 + $0x46] sm:$0x3] }
  0xc3   : > { %1069 = vmatmul.msk.bf16.vlgmr.msrb.gmra.mxu0 %vm215_vm1, %v1068_v51 }
  0xcb   : > { %1073 = vmatmul.msk.bf16.vlgmr.msrb.gmra.mxu2 %vm215_vm1, %v1072_v52  ;;  %1071 = vmatmul.msk.bf16.vlgmr.msrb.gmra.mxu1 %vm215_vm1, %v1070_v53 }
  0xce   : > { %v573_v54 = vpop.permute.xlu1 %572  ;;  %v691_v57 = vpop.permute.xlu2 %690 }
  0xcf   : > { %v578_v55 = vsel %vm219_vm0, %v573_v54, 0  ;;  %v696_v59 = vsel %vm219_vm0, %v691_v57, 0 }
  0xd0   : > { %587 = vmatpush.bf16.msrb.mxu3 %v578_v55 }
  0xd3   : > { %1075 = vmatmul.msk.bf16.vlgmr.msrb.gmra.mxu3 %vm215_vm1, %v1074_v56 }
  0xd4   : > { %678 = vmatpush.bf16.msra.mxu3 %v1292_v17  ;;  %v813_v17 = vlaneseq }
  0xd6   : > { %v603_v58 = vpop.permute.xlu0 %602  ;;  %v814_v18 = vshrl.u32 %v813_v17, 7  ;;  %v817_v20 = vand.u32 127, %v813_v17 }
  0xd7   : > { %v608_v60 = vsel %vm219_vm0, %v603_v58, 0 }
  0xd8   : > { %617 = vmatpush.bf16.msra.mxu0 %v608_v60  ;;  %v815_v19 = vadd.s32 8, %v814_v18  ;;  %v818_v26 = vmul.u32 2, %v814_v18 }
  0xda   : > { %v819_v21 = vmul.u32 2, %v815_v19  ;;  %vm1424_vm4 = vcmp.eq.s32.totalorder %v817_v20, %v818_v26  ;;  %v826_v35 = vadd.s32 1, %v818_v26 }
  0xdb   : > { %1078 = vmatmul.msk.bf16.vlgmr.msra.gmra.mxu0 %vm215_vm1, %v1077_v61  ;;  %1079 = vmatmul.msk.bf16.vlgmr.msra.gmra.mxu1 %vm215_vm1, %v1076_v62 }
  0xdc   : > { %705 = vmatpush.bf16.msrb.mxu0 %v696_v59  ;;  %vm821_vm2 = vcmp.eq.s32.totalorder %v817_v20, %v819_v21  ;;  %v827_v31 = vadd.s32 1, %v819_v21  ;;  %vm828_vm6 = vcmp.eq.s32.totalorder %v817_v20, %v826_v35 }
  0xdd   : > { %v1095_v25 = vsel %vm821_vm2, 1.0, %v1208_v24 }
  0xde   : > { %v645_v63 = vpop.permute.xlu1 %644  ;;  %vm829_vm5 = vcmp.eq.s32.totalorder %v817_v20, %v827_v31 }
  0xdf   : > { %v650_v0 = vsel %vm219_vm0, %v645_v63, 0  ;;  %v1097_v34 = vsel %vm829_vm5, 1.0, %v1208_v24 }
  0xe0   : > { %659 = vmatpush.bf16.msra.mxu2 %v650_v0 }
  0xe3   : > { %1081 = vmatmul.msk.bf16.vlgmr.msra.gmra.mxu2 %vm215_vm1, %v1080_v1  ;;  %1083 = vmatmul.msk.bf16.vlgmr.msra.gmra.mxu3 %vm215_vm1, %v1082_v2 }
  0xe4   : > { %751 = vmatpush.bf16.msrb.mxu2 %v551_v42 }
  0xe6   : > { %v791_v3 = vpop.permute.xlu2 %790 }
  0xe7   : > { %v796_v4 = vsel %vm219_vm0, %v791_v3, 0 }
  0xe8   : > { %805 = vmatpush.bf16.msra.mxu0 %v796_v4  ;;  %1101 = vmatpush.msk.msra.mxu2 %vm838_vm3, %v1095_v25 }
  0xea   : > { %1102 = vmatpush.msk.msra.mxu2 %vm1424_vm4, %v1209_v28 }
  0xeb   : > { %1085 = vmatmul.msk.bf16.vlgmr.msrb.gmra.mxu0 %vm215_vm1, %v1084_v5 }
  0xee   : > { %v718_v6 = vpop.permute.xlu1 %717 }
  0xef   : > { %v723_v7 = vsel %vm219_vm0, %v718_v6, 0 }
  0xf0   : > { %732 = vmatpush.bf16.msrb.mxu1 %v723_v7 }
  0xf3   : > { %1089 = vmatmul.msk.bf16.vlgmr.msrb.gmra.mxu2 %vm215_vm1, %v1088_v8  ;;  %1087 = vmatmul.msk.bf16.vlgmr.msrb.gmra.mxu1 %vm215_vm1, %v1086_v9 }
  0xf4   : > { %1098 = vmatpush.msk.msra.mxu1 %vm838_vm3, %v1097_v34 }
  0xf6   : > { %v764_v11 = vpop.permute.xlu0 %763  ;;  %1099 = vmatpush.msk.msra.mxu1 %vm828_vm6, %v1209_v28 }
  0xf7   : > { %v769_v12 = vsel %vm219_vm0, %v764_v11, 0 }
  0xf8   : > { %778 = vmatpush.bf16.msrb.mxu3 %v769_v12  ;;  %1107 = vmatpush.msk.msrb.mxu1 %vm838_vm3, %v1095_v25 }
  0xfa   : > { %1108 = vmatpush.msk.msrb.mxu1 %vm1424_vm4, %v1209_v28 }
  0xfb   : > { %1091 = vmatmul.msk.bf16.vlgmr.msrb.gmra.mxu3 %vm215_vm1, %v1090_v13  ;;  %1093 = vmatmul.msk.bf16.vlgmr.msra.gmra.mxu0 %vm215_vm1, %v1092_v14 }
  0xfc   : > { %1104 = vmatpush.msk.msra.mxu3 %vm838_vm3, %v1097_v34 }
  0xfe   : > { %1105 = vmatpush.msk.msra.mxu3 %vm828_vm6, %v1209_v28  ;;  %v1433_v38 = vpop.permute.xlu0 %306 }
 0x110   : > { %v232_v30 = vpop.f32.mrf.mxu0 }
 0x111   : > { %v251_v32 = vadd.f32 %v250_v10, %v232_v30 }
 0x113   : > { %v275_v36 = vadd.f32 %v271_v16, %v251_v32 }
 0x118   : > { %v234_v33 = vpop.f32.mrf.mxu0 }
 0x11e   : > { %v298_v37 = vpop.f32.mrf.mxu3 }
 0x11f   : > { %v302_v39 = vadd.f32 %v298_v37, %v275_v36 }
 0x120   : > { %v334_v40 = vpop.f32.mrf.mxu0 }
 0x121   : > { %v309_v41 = vadd.f32 %v1433_v38, %v302_v39  ;;  %v351_v44 = vadd.f32 %v350_v22, %v334_v40 }
 0x123   : > { %1103 = vmatmul.msk.f32.vlgmr.msra.gmra.mxu2 %vm834_vm7, %v309_v41 }
 0x126   : > { %v300_v42 = vpop.f32.mrf.mxu3 }
 0x128   : > { %v336_v43 = vpop.f32.mrf.mxu0 }
 0x12e   : > { %v376_v45 = vpop.f32.mrf.mxu2  ;;  %v395_v46 = vpop.f32.mrf.mxu3 }
 0x12f   : > { %v380_v47 = vadd.f32 %v376_v45, %v351_v44 }
 0x130   : > { %v422_v48 = vpop.f32.mrf.mxu0 }
 0x131   : > { %v399_v49 = vadd.f32 %v395_v46, %v380_v47 }
 0x133   : > { %v426_v50 = vadd.f32 %v422_v48, %v399_v49 }
 0x136   : > { %v378_v51 = vpop.f32.mrf.mxu2  ;;  %v397_v52 = vpop.f32.mrf.mxu3 }
 0x138   : > { %v449_v53 = vpop.f32.mrf.mxu1  ;;  %v424_v54 = vpop.f32.mrf.mxu0 }
 0x139   : > { %v453_v55 = vadd.f32 %v449_v53, %v426_v50 }
 0x13b   : > { %v454_v56 = vadd.f32 %v453_v55, %v1433_v38 }
 0x13d   : > { %1100 = vmatmul.msk.f32.vlgmr.msra.gmra.mxu1 %vm834_vm7, %v454_v56 }
 0x13e   : > { %v479_v57 = vpop.f32.mrf.mxu2 }
 0x13f   : > { %v495_v58 = vpop.f32.mrf.mxu3 }
 0x140   : > { %v451_v59 = vpop.f32.mrf.mxu1  ;;  %v513_v60 = vpop.f32.mrf.mxu0  ;;  %v496_v1 = vadd.f32 %v495_v58, %v479_v57 }
 0x142   : > { %v517_v2 = vadd.f32 %v513_v60, %v496_v1 }
 0x146   : > { %v481_v61 = vpop.f32.mrf.mxu2 }
 0x147   : > { %v497_v62 = vpop.f32.mrf.mxu3 }
 0x148   : > { %v540_v63 = vpop.f32.mrf.mxu1  ;;  %v515_v0 = vpop.f32.mrf.mxu0 }
 0x149   : > { %v544_v5 = vadd.f32 %v540_v63, %v517_v2 }
 0x14e   : > { %v562_v3 = vpop.f32.mrf.mxu2 }
 0x14f   : > { %v566_v6 = vadd.f32 %v562_v3, %v544_v5 }
 0x150   : > { %v542_v4 = vpop.f32.mrf.mxu1 }
 0x156   : > { %v589_v7 = vpop.f32.mrf.mxu3  ;;  %v564_v8 = vpop.f32.mrf.mxu2 }
 0x157   : > { %v593_v9 = vadd.f32 %v589_v7, %v566_v6 }
 0x158   : > { %v619_v10 = vpop.f32.mrf.mxu0  ;;  %v635_v11 = vpop.f32.mrf.mxu1 }
 0x159   : > { %v594_v12 = vadd.f32 %v593_v9, %v1433_v38  ;;  %v636_v21 = vadd.f32 %v635_v11, %v619_v10 }
 0x15b   : > { %1109 = vmatmul.msk.f32.vlgmr.msrb.gmra.mxu1 %vm834_vm7, %v594_v12 }
 0x15e   : > { %v591_v13 = vpop.f32.mrf.mxu3 }
 0x160   : > { %v621_v14 = vpop.f32.mrf.mxu0  ;;  %v637_v15 = vpop.f32.mrf.mxu1 }
 0x166   : > { %v661_v16 = vpop.f32.mrf.mxu2  ;;  %v680_v17 = vpop.f32.mrf.mxu3 }
 0x167   : > { %v665_v24 = vadd.f32 %v661_v16, %v636_v21 }
 0x168   : > { %v707_v18 = vpop.f32.mrf.mxu0 }
 0x169   : > { %v684_v25 = vadd.f32 %v680_v17, %v665_v24 }
 0x16b   : > { %v711_v29 = vadd.f32 %v707_v18, %v684_v25 }
 0x16e   : > { %v663_v19 = vpop.f32.mrf.mxu2  ;;  %v682_v20 = vpop.f32.mrf.mxu3 }
 0x170   : > { %v734_v22 = vpop.f32.mrf.mxu1  ;;  %v709_v23 = vpop.f32.mrf.mxu0 }
 0x171   : > { %v738_v30 = vadd.f32 %v734_v22, %v711_v29 }
 0x176   : > { %v753_v26 = vpop.f32.mrf.mxu2 }
 0x177   : > { %v757_v31 = vadd.f32 %v753_v26, %v738_v30 }
 0x178   : > { %v807_v27 = vpop.f32.mrf.mxu0  ;;  %v736_v28 = vpop.f32.mrf.mxu1 }
 0x17e   : > { %v780_v32 = vpop.f32.mrf.mxu3  ;;  %v755_v33 = vpop.f32.mrf.mxu2 }
 0x17f   : > { %v784_v34 = vadd.f32 %v780_v32, %v757_v31 }
 0x180   : > { %v809_v35 = vpop.f32.mrf.mxu0 }
 0x181   : > { %v811_v36 = vadd.f32 %v807_v27, %v784_v34 }
 0x183   : > { %v812_v37 = vadd.f32 %v811_v36, %v1433_v38 }
 0x185   : > { %1106 = vmatmul.msk.f32.vlgmr.msra.gmra.mxu3 %vm834_vm7, %v812_v37 }
 0x186   : > { %v782_v39 = vpop.f32.mrf.mxu3 }
 0x1a6   : > { %v885_v40 = vpop.f32.mrf.mxu2 }
 0x1ba   : > { %v859_v41 = vpop.f32.mrf.mxu1 }
 0x1bb   : > { %v886_v42 = vadd.f32 %v885_v40, %v859_v41 }
 0x1bd   : > { %1161 = vtanh.f32 %v886_v42 }
 0x1c3   : > { %v1162_v43 = vpop.eup %1161 }
 0x1c4   : > { %937 = vst.msk [vmem:[%s192_s24] sm:$0x7] %vm936_vm8, %v1162_v43 }
 0x1d8   : > { %v931_v38 = vpop.f32.mrf.mxu1 }
 0x208   : > { %v908_v44 = vpop.f32.mrf.mxu3 }
 0x209   : > { %v932_v45 = vadd.f32 %v931_v38, %v908_v44 }
 0x20b   : > { %1163 = vtanh.f32 %v932_v45 }
 0x211   : > { %v1164_v46 = vpop.eup %1163 }
 0x212   : > { %1110 = vst.msk [vmem:[%s192_s24 + $0x4] sm:$0x7] %vm936_vm8, %v1164_v46 }
 0x213 PF: > { %s13_s16 = sadd.s32 1, %s1203_s16   ;;  %s1472_s12 = smov %s1195_s14 }
 0x214   : > { %p10_p7 = scmp.ge.s32.totalorder %s13_s16, 24   ;;  %s1473_s13 = smov %s1199_s15 }
 0x215   : > { %s1474_s14 = smov %s1477_s17  ;;  %s1475_s15 = smov %s1481_s18 }
 0x216   :  { %12 = sbr.rel (!%p10_p7) target bundleno = 3 (0x3), region = 90 }

</bundles_post_ra>
